<compile_context>
chip_gen: v7x
topology: tpu7x:2x2x1
jax: 0.10.0
libtpu: 0.0.40
codegen_flags: <defaults>
</compile_context>

<pallas_src>
import jax
import jax.numpy as jnp
from jax.experimental import pallas as pl
from jax.experimental.pallas import tpu as pltpu


def _conv1x1_relu_kernel(w_ref, x_ref, b_ref, o_ref):
    # w_ref: (tn, Cin)  one Cout slab of the weight (compute dtype, e.g. bf16)
    # x_ref: (Cin, L)   whole (channels x spatial) activation slab (f32)
    # b_ref: (tn, 1)    bias slab (f32), broadcast over spatial
    # o_ref: (tn, L)    output slab (f32); ragged last slab is masked on write
    x = x_ref[...].astype(w_ref.dtype)  # VPU cast; no-op on the f32 path
    acc = jnp.dot(w_ref[...], x, preferred_element_type=jnp.float32)
    acc = acc + b_ref[...]
    o_ref[...] = jnp.maximum(acc, 0.0).astype(o_ref.dtype)


def _pick_tn():
    # v7x: 2 TensorCores, grid=(4,) gives each TC 2 pipelined steps.
    # v5e/v6e: single TC, grid=(2,) already pipelines; extra steps just add overhead.
    try:
        kind = jax.devices()[0].device_kind.lower()
    except Exception:
        return 512
    return 256 if "v7" in kind else 512


def conv1x1_relu(x_nchw, weight, bias, *, tn=None, compute_dtype=jnp.bfloat16):
    """1x1 conv (stride 1) + ReLU, computed as relu(W @ X + b).

    x_nchw: (N, Cin, H, W) float32
    weight: (Cout, Cin, 1, 1); pre-cast to `compute_dtype` outside jit to avoid
            a per-call cast pass (the in-wrapper astype then no-ops).
    bias:   (Cout,) float32
    returns (N, Cout, H, W) float32

    compute_dtype=jnp.bfloat16 (default) halves weight HBM traffic and uses the
    full-rate MXU path on v5e/v6e; accumulation stays float32.  Pass
    compute_dtype=jnp.float32 to reproduce the PyTorch module's numerics exactly.
    """
    N, Cin, H, W = x_nchw.shape
    Cout = weight.shape[0]
    HW = H * W
    L = N * HW
    if tn is None:
        tn = _pick_tn()

    # X: (Cin, N*HW).  For N == 1 this is a pure layout no-op (no HBM copy).
    # TODO(synk): for N > 1, use a (N, Cin, HW) input with a grid axis over N
    # instead of this transpose (which is a real HBM copy when N > 1).
    x_mat = x_nchw.reshape(N, Cin, HW).transpose(1, 0, 2).reshape(Cin, L)
    # Weight: (Cout, Cin).  astype is a no-op when the weight is already stored
    # in compute_dtype (recommended: cast once outside the jitted call).
    w_mat = weight.reshape(Cout, Cin).astype(compute_dtype)
    b_col = bias.reshape(Cout, 1).astype(jnp.float32)

    grid = (pl.cdiv(Cout, tn),)  # ragged last Cout block is masked on write

    flops = 2 * Cout * Cin * L
    bytes_accessed = (
        w_mat.size * w_mat.dtype.itemsize
        + x_mat.size * x_mat.dtype.itemsize
        + b_col.size * b_col.dtype.itemsize
        + Cout * L * 4
    )

    out_mat = pl.pallas_call(
        _conv1x1_relu_kernel,
        out_shape=jax.ShapeDtypeStruct((Cout, L), jnp.float32),
        grid_spec=pltpu.PrefetchScalarGridSpec(
            num_scalar_prefetch=0,
            grid=grid,
            in_specs=[
                # Disjoint Cout slab of W per grid step (no redundant W traffic).
                pl.BlockSpec((tn, Cin), lambda j: (j, 0)),
                # Whole activation; constant block index -> DMA'd only once.
                pl.BlockSpec((Cin, L), lambda j: (0, 0)),
                # Bias slab matching the Cout slab.
                pl.BlockSpec((tn, 1), lambda j: (j, 0)),
            ],
            out_specs=pl.BlockSpec((tn, L), lambda j: (j, 0)),
        ),
        compiler_params=pltpu.CompilerParams(
            dimension_semantics=("parallel",),  # shards Cout slabs across TCs on v7x
        ),
        cost_estimate=pl.CostEstimate(
            flops=flops, transcendentals=0, bytes_accessed=bytes_accessed
        ),
    )(w_mat, x_mat, b_col)

    # (Cout, N*HW) -> (N, Cout, H, W); a layout no-op for N == 1.
    return out_mat.reshape(Cout, N, HW).transpose(1, 0, 2).reshape(N, Cout, H, W)


if __name__ == "__main__":
    # Shapes implied by the module: Conv2d(512 -> 1000, 1x1), input (1, 512, 13, 13)
    N, Cin, H, W = 1, 512, 13, 13
    Cout = 1000

    key = jax.random.PRNGKey(0)
    kx, kw, kb = jax.random.split(key, 3)

    x = jax.random.normal(kx, (N, Cin, H, W), dtype=jnp.float32)
    weight = jax.random.normal(kw, (Cout, Cin, 1, 1), dtype=jnp.float32) * (
        1.0 / jnp.sqrt(Cin)
    )
    bias = jax.random.normal(kb, (Cout,), dtype=jnp.float32) * 0.01

    # Hoisted one-time weight cast (per perf review: not a per-call HBM pass).
    weight_prepped = weight.astype(jnp.bfloat16)

    fn = jax.jit(conv1x1_relu)
    out = jax.block_until_ready(fn(x, weight_prepped, bias))

    # Reference in full f32 (same math as the PyTorch module).
    w_mat = weight.reshape(Cout, Cin)
    x_mat = x.reshape(Cin, H * W)
    ref = jnp.maximum(w_mat @ x_mat + bias[:, None], 0.0).reshape(1, Cout, H, W)

    assert out.shape == (N, Cout, H, W)
    # bf16 weights/activations with f32 accumulation: loosened tolerance.
    assert jnp.allclose(out, ref, atol=5e-2, rtol=5e-2)

    print("KERNEL_OK")
</pallas_src>

<mosaic_0001>
module attributes {stable_mosaic.version = 11 : i64} {
  func.func @_conv1x1_relu_kernel(%arg0: i32, %arg1: memref<512x512xbf16, #tpu.memory_space<vmem>>, %arg2: memref<512x169xf32, #tpu.memory_space<vmem>>, %arg3: memref<512x1xf32, #tpu.memory_space<vmem>>, %arg4: memref<512x169xf32, #tpu.memory_space<vmem>>) attributes {dimension_semantics = [#tpu.dimension_semantics<parallel>], iteration_bounds = array<i64: 2>, scalar_prefetch = 0 : i64, scratch_operands = 0 : i64, tpu.core_type = #tpu.core_type<tc>, window_params = [{transform_indices = @transform_0, window_bounds = array<i64: 512, 512>}, {pipeline_mode = #tpu.pipeline_mode<synchronous>, transform_indices = @transform_1, window_bounds = array<i64: 512, 169>}, {transform_indices = @transform_2, window_bounds = array<i64: 512, 1>}, {transform_indices = @transform_3, window_bounds = array<i64: 512, 169>}]} {
    %c0 = arith.constant 0 : index
    %c0_0 = arith.constant 0 : index
    %0 = vector.load %arg2[%c0, %c0_0] : memref<512x169xf32, #tpu.memory_space<vmem>>, vector<512x169xf32>
    %1 = arith.truncf %0 : vector<512x169xf32> to vector<512x169xbf16>
    %c0_1 = arith.constant 0 : index
    %c0_2 = arith.constant 0 : index
    %2 = vector.load %arg1[%c0_1, %c0_2] : memref<512x512xbf16, #tpu.memory_space<vmem>>, vector<512x512xbf16>
    %cst = arith.constant dense<0.000000e+00> : vector<512x169xf32>
    %3 = tpu.matmul %2, %1, %cst {dimension_numbers = #tpu.dot_dimension_numbers<[1], [0], [0], [1], [0, 0, 1, 1], [], []>} : vector<512x512xbf16>, vector<512x169xbf16>, vector<512x169xf32> -> vector<512x169xf32>
    %c0_3 = arith.constant 0 : index
    %c0_4 = arith.constant 0 : index
    %4 = vector.load %arg3[%c0_3, %c0_4] : memref<512x1xf32, #tpu.memory_space<vmem>>, vector<512x1xf32>
    %5 = vector.broadcast %4 : vector<512x1xf32> to vector<512x169xf32>
    %6 = arith.addf %3, %5 : vector<512x169xf32>
    %cst_5 = arith.constant 0.000000e+00 : f32
    %7 = vector.broadcast %cst_5 : f32 to vector<512x169xf32>
    %8 = arith.maximumf %6, %7 : vector<512x169xf32>
    %c0_6 = arith.constant 0 : index
    %c0_7 = arith.constant 0 : index
    %9 = vector.load %arg4[%c0_6, %c0_7] : memref<512x169xf32, #tpu.memory_space<vmem>>, vector<512x169xf32>
    tpu.vector_store %arg4[%c0_6, %c0_7], %8 {strides = array<i32>} : memref<512x169xf32, #tpu.memory_space<vmem>>, vector<512x169xf32>,
    return
  }
  func.func @transform_0(%arg0: i32) -> (i32, i32) {
    %c0_i32 = arith.constant 0 : i32
    %c0_i32_0 = arith.constant 0 : i32
    return %arg0, %c0_i32 : i32, i32
  }
  func.func @transform_1(%arg0: i32) -> (i32, i32) {
    %c0_i32 = arith.constant 0 : i32
    %c0_i32_0 = arith.constant 0 : i32
    %c0_i32_1 = arith.constant 0 : i32
    return %c0_i32, %c0_i32_0 : i32, i32
  }
  func.func @transform_2(%arg0: i32) -> (i32, i32) {
    %c0_i32 = arith.constant 0 : i32
    %c0_i32_0 = arith.constant 0 : i32
    return %arg0, %c0_i32 : i32, i32
  }
  func.func @transform_3(%arg0: i32) -> (i32, i32) {
    %c0_i32 = arith.constant 0 : i32
    %c0_i32_0 = arith.constant 0 : i32
    return %arg0, %c0_i32 : i32, i32
  }
}

</mosaic_0001>

<bundles_post_ra>
// kernel: conv1x1_relu.1
= control target key start
LH: loop header
LB: loop body
LE: loop exit
PB: predicated region body
PF: predicated region fallthrough
CT: control target
= control target key end

     0   :  { %s3657_s12 = smov 0   ;;  %s3659_s13 = smov 0   ;;  %s4688_s0 = inlined_call_operand.vmem [shape: bf16[1000,512], index: 0, kind: input, shape index: {}]   ;;  %s4689_s1 = inlined_call_operand.vmem [shape: f32[512,169], index: 1, kind: input, shape index: {}]   ;;  %s4690_s2 = inlined_call_operand.vmem [shape: f32[1000,1], index: 2, kind: input, shape index: {}]   ;;  %s4691_s3 = inlined_call_operand.vmem [shape: f32[1000,169], index: 3, kind: output, shape index: {}]  }
   0x1   :  { %s3661_s14 = smov 0  }
   0x2 LB: > { %s3670_s15 = sadd.s32 4294967295, %s3602_s14   ;;  %s3672_s16 = sadd.s32 1, %s3602_s14   ;;  %s3602_s14 = sphi %s3661_s14, %s4700_s14   ;;  %s3598_s13 = sphi %s3659_s13, %s4699_s13   ;;  %s3594_s12 = sphi %s3657_s12, %s4698_s12  }
   0x3   : > { %s90_s17 = ssub.s32 %s3602_s14, %s3672_s16  ;;  %s93_s18 = sadd.s32 1, %s3598_s13 }
   0x4   : > { %p91_p0 = scmp.eq.s32.totalorder %s90_s17, 0  ;;  %p103_p1 = scmp.ne.s32.totalorder %s3598_s13, %s3594_s12 }
   0x5   : > { %p104_p2 = scmp.eq.s32.totalorder %s3670_s15, 1  ;;  %p2849_p3 = scmp.ge.s32.totalorder %s3602_s14, 1 }
   0x6   : > { %s3680_s19 = scalar_select %p91_p0, %s3598_s13, %s93_s18  }
   0x7   : > { %p3682_p4 = por %p104_p2, %p103_p1  ;;  %p168_p5 = scmp.lt.s32.totalorder %s3602_s14, 3 }
   0x9   : > { %p169_p6 = pnand %p2849_p3, %p168_p5 }
   0xa   : > { %v244_v0 = vld [vmem:[%s4689_s1 + $0x8] sm:$0xff] (!%p169_p6)  ;;  %v246_v1 = vld [vmem:[%s4689_s1 + $0x18] sm:$0xff] (!%p169_p6)  ;;  %v243_v5 = vld [vmem:[%s4689_s1] sm:$0xff] (!%p169_p6)  ;;  %s3885_s27 = sshll.u32 (!%p169_p6), %s3670_s15, 6  ;;  %vm2422_vm0 = vcmask (!%p169_p6), 334848  }
   0xb   : > { %172 = sbr.rel (%p169_p6) target bundleno = 619 (0x26b), region = 32  ;;  %v308_v2 = vld [vmem:[%s4689_s1 + $0x208] sm:$0xff] (!%p169_p6)  ;;  %v372_v3 = vpack.c.bf16 (!%p169_p6), %v246_v1, %v244_v0  ;;  %v310_v4 = vld [vmem:[%s4689_s1 + $0x218] sm:$0xff] (!%p169_p6)  ;;  %v245_v6 = vld [vmem:[%s4689_s1 + $0x10] sm:$0xff] (!%p169_p6)  ;;  %p212_p7 = scmp.lt.s32.totalorder (!%p169_p6), %s3885_s27, 124 }
   0xc   : > { %v404_v7 = vpack.c.bf16 (!%p169_p6), %v310_v4, %v308_v2  ;;  %v371_v8 = vpack.c.bf16 (!%p169_p6), %v245_v6, %v243_v5  ;;  %v307_v9 = vld [vmem:[%s4689_s1 + $0x200] sm:$0xff] (!%p169_p6)  ;;  %v309_v10 = vld [vmem:[%s4689_s1 + $0x210] sm:$0xff] (!%p169_p6)  ;;  %v248_v11 = vld [vmem:[%s4689_s1 + $0x28] sm:$0xff] (!%p169_p6) }
   0xd   : > { %1587 = vmatprep.subr.bf16.mxu1 (!%p169_p6), %v372_v3  ;;  %v403_v12 = vpack.c.bf16 (!%p169_p6), %v309_v10, %v307_v9  ;;  %v250_v13 = vld [vmem:[%s4689_s1 + $0x38] sm:$0xff] (!%p169_p6)  ;;  %v312_v14 = vld [vmem:[%s4689_s1 + $0x228] sm:$0xff] (!%p169_p6)  ;;  %v247_v18 = vld [vmem:[%s4689_s1 + $0x20] sm:$0xff] (!%p169_p6) }
   0xe   : > { %v314_v15 = vld [vmem:[%s4689_s1 + $0x238] sm:$0xff] (!%p169_p6)  ;;  %1940 = vmatprep.subr.bf16.mxu0 (!%p169_p6), %v404_v7  ;;  %1588 = vmatpush1.bf16.msra.mxu1 (!%p169_p6), %v371_v8  ;;  %v374_v16 = vpack.c.bf16 (!%p169_p6), %v250_v13, %v248_v11  ;;  %v249_v19 = vld [vmem:[%s4689_s1 + $0x30] sm:$0xff] (!%p169_p6)  ;;  %v311_v20 = vld [vmem:[%s4689_s1 + $0x220] sm:$0xff] (!%p169_p6) }
   0xf   : > { %v406_v17 = vpack.c.bf16 (!%p169_p6), %v314_v15, %v312_v14  ;;  %1941 = vmatpush1.bf16.msra.mxu0 (!%p169_p6), %v403_v12  ;;  %v373_v21 = vpack.c.bf16 (!%p169_p6), %v249_v19, %v247_v18  ;;  %v313_v22 = vld [vmem:[%s4689_s1 + $0x230] sm:$0xff] (!%p169_p6)  ;;  %v252_v23 = vld [vmem:[%s4689_s1 + $0x48] sm:$0xff] (!%p169_p6)  ;;  %v254_v24 = vld [vmem:[%s4689_s1 + $0x58] sm:$0xff] (!%p169_p6) }
  0x10   : > { %1589 = vmatprep.subr.bf16.mxu1 (!%p169_p6), %v374_v16  ;;  %v405_v25 = vpack.c.bf16 (!%p169_p6), %v313_v22, %v311_v20  ;;  %v376_v26 = vpack.c.bf16 (!%p169_p6), %v254_v24, %v252_v23  ;;  %v316_v27 = vld [vmem:[%s4689_s1 + $0x248] sm:$0xff] (!%p169_p6)  ;;  %v318_v28 = vld [vmem:[%s4689_s1 + $0x258] sm:$0xff] (!%p169_p6)  ;;  %v251_v29 = vld [vmem:[%s4689_s1 + $0x40] sm:$0xff] (!%p169_p6)  ;;  %v3636_v20 = vmov (!%p169_p6), 0  }
  0x11   : > { %1942 = vmatprep.subr.bf16.mxu0 (!%p169_p6), %v406_v17  ;;  %v408_v30 = vpack.c.bf16 (!%p169_p6), %v318_v28, %v316_v27  ;;  %v253_v31 = vld [vmem:[%s4689_s1 + $0x50] sm:$0xff] (!%p169_p6)  ;;  %v315_v32 = vld [vmem:[%s4689_s1 + $0x240] sm:$0xff] (!%p169_p6)  ;;  %v256_v35 = vld [vmem:[%s4689_s1 + $0x68] sm:$0xff] (!%p169_p6)  ;;  %3354 = vset.pattern.permute.xlu0 (!%p169_p6), %v3636_v20 }
  0x12   : > { %v317_v33 = vld [vmem:[%s4689_s1 + $0x250] sm:$0xff]  ;;  %1590 = vmatpush1.bf16.msra.mxu1 %v373_v21  ;;  %v375_v34 = vpack.c.bf16 %v253_v31, %v251_v29  ;;  %v258_v36 = vld [vmem:[%s4689_s1 + $0x78] sm:$0xff]  ;;  %v320_v37 = vld [vmem:[%s4689_s1 + $0x268] sm:$0xff]  ;;  %3355 = vset.pattern.permute.xlu1 %v3636_v20  ;;  %s3930_s7 = scalar_select %p212_p7, %s3885_s27, 124 }
  0x13   : > { %1943 = vmatpush1.bf16.msra.mxu0 %v405_v25  ;;  %1591 = vmatprep.subr.bf16.mxu1 %v376_v26  ;;  %v407_v38 = vpack.c.bf16 %v317_v33, %v315_v32  ;;  %v378_v39 = vpack.c.bf16 %v258_v36, %v256_v35  ;;  %v322_v40 = vld [vmem:[%s4689_s1 + $0x278] sm:$0xff]  ;;  %v255_v41 = vld [vmem:[%s4689_s1 + $0x60] sm:$0xff]  ;;  %v257_v42 = vld [vmem:[%s4689_s1 + $0x70] sm:$0xff]  ;;  %s3006_s30 = sshll.u32 (%p3682_p4), %s3670_s15, 10 }
  0x14   : > { %1944 = vmatprep.subr.bf16.mxu0 %v408_v30  ;;  %v410_v43 = vpack.c.bf16 %v322_v40, %v320_v37  ;;  %v319_v44 = vld [vmem:[%s4689_s1 + $0x260] sm:$0xff]  ;;  %v321_v45 = vld [vmem:[%s4689_s1 + $0x270] sm:$0xff]  ;;  %v260_v46 = vld [vmem:[%s4689_s1 + $0x88] sm:$0xff]  ;;  %v377_v50 = vpack.c.bf16 %v257_v42, %v255_v41  ;;  %s3003_s4 = sshll.u32 %s3930_s7, 4  ;;  %s2855_s24 = sshll.u32 %s3930_s7, 3 }
  0x15   : > { %v262_v47 = vld [vmem:[%s4689_s1 + $0x98] sm:$0xff]  ;;  %v324_v48 = vld [vmem:[%s4689_s1 + $0x288] sm:$0xff]  ;;  %v409_v51 = vpack.c.bf16 %v321_v45, %v319_v44  ;;  %v259_v53 = vld [vmem:[%s4689_s1 + $0x80] sm:$0xff]  ;;  %s3984_s5 = scalar_lea.vmem %s4688_s0, %s3003_s4  ;;  %s4095_s28 = scalar_lea.vmem %s4690_s2, %s2855_s24 }
  0x16   : > { %v326_v49 = vld [vmem:[%s4689_s1 + $0x298] sm:$0xff]  ;;  %1592 = vmatpush1.bf16.msra.mxu1 %v375_v34  ;;  %v380_v52 = vpack.c.bf16 %v262_v47, %v260_v46  ;;  %v261_v54 = vld [vmem:[%s4689_s1 + $0x90] sm:$0xff]  ;;  %v323_v55 = vld [vmem:[%s4689_s1 + $0x280] sm:$0xff]  ;;  %s203_s7 = sand.u32 1, %s3594_s12   ;;  %s4485_s9 = scalar_lea.vmem (%p3682_p4), %s4691_s3, %s3006_s30  }
  0x17   : > { %1945 = vmatpush1.bf16.msra.mxu0 %v407_v38  ;;  %1593 = vmatprep.subr.bf16.mxu1 %v378_v39  ;;  %v412_v56 = vpack.c.bf16 %v326_v49, %v324_v48  ;;  %v325_v57 = vld [vmem:[%s4689_s1 + $0x290] sm:$0xff]  ;;  %v264_v58 = vld [vmem:[%s4689_s1 + $0xa8] sm:$0xff]  ;;  %v266_v59 = vld [vmem:[%s4689_s1 + $0xb8] sm:$0xff]  ;;  %v379_v62 = vpack.c.bf16 %v261_v54, %v259_v53  ;;  %s2850_s29 = sshll.u32 %s203_s7, 10 }
  0x18   : > { %1946 = vmatprep.subr.bf16.mxu0 %v410_v43  ;;  %v328_v60 = vld [vmem:[%s4689_s1 + $0x2a8] sm:$0xff]  ;;  %v330_v61 = vld [vmem:[%s4689_s1 + $0x2b8] sm:$0xff]  ;;  %v411_v63 = vpack.c.bf16 %v325_v57, %v323_v55  ;;  %v382_v0 = vpack.c.bf16 %v266_v59, %v264_v58  ;;  %v263_v1 = vld [vmem:[%s4689_s1 + $0xa0] sm:$0xff]  ;;  %s4270_s12 = scalar_lea.vmem [#allocation2], %s2850_s29  }
  0x19   : > { %v265_v2 = vld [vmem:[%s4689_s1 + $0xb0] sm:$0xff]  ;;  %v327_v3 = vld [vmem:[%s4689_s1 + $0x2a0] sm:$0xff]  ;;  %v414_v4 = vpack.c.bf16 %v330_v61, %v328_v60  ;;  %v268_v6 = vld [vmem:[%s4689_s1 + $0xc8] sm:$0xff] }
  0x1a   : > { %1594 = vmatpush1.bf16.msra.mxu1 %v377_v50  ;;  %v329_v5 = vld [vmem:[%s4689_s1 + $0x2b0] sm:$0xff]  ;;  %v270_v7 = vld [vmem:[%s4689_s1 + $0xd8] sm:$0xff]  ;;  %v332_v8 = vld [vmem:[%s4689_s1 + $0x2c8] sm:$0xff]  ;;  %v381_v10 = vpack.c.bf16 %v265_v2, %v263_v1 }
  0x1b   : > { %1947 = vmatpush1.bf16.msra.mxu0 %v409_v51  ;;  %1595 = vmatprep.subr.bf16.mxu1 %v380_v52  ;;  %v334_v9 = vld [vmem:[%s4689_s1 + $0x2d8] sm:$0xff]  ;;  %v413_v11 = vpack.c.bf16 %v329_v5, %v327_v3  ;;  %v384_v12 = vpack.c.bf16 %v270_v7, %v268_v6  ;;  %v267_v13 = vld [vmem:[%s4689_s1 + $0xc0] sm:$0xff]  ;;  %v269_v14 = vld [vmem:[%s4689_s1 + $0xd0] sm:$0xff] }
  0x1c   : > { %1948 = vmatprep.subr.bf16.mxu0 %v412_v56  ;;  %v331_v15 = vld [vmem:[%s4689_s1 + $0x2c0] sm:$0xff]  ;;  %v416_v16 = vpack.c.bf16 %v334_v9, %v332_v8  ;;  %v333_v17 = vld [vmem:[%s4689_s1 + $0x2d0] sm:$0xff]  ;;  %v272_v18 = vld [vmem:[%s4689_s1 + $0xe8] sm:$0xff]  ;;  %v383_v23 = vpack.c.bf16 %v269_v14, %v267_v13 }
  0x1d   : > { %v274_v19 = vld [vmem:[%s4689_s1 + $0xf8] sm:$0xff]  ;;  %v336_v21 = vld [vmem:[%s4689_s1 + $0x2e8] sm:$0xff]  ;;  %v415_v24 = vpack.c.bf16 %v333_v17, %v331_v15  ;;  %v271_v26 = vld [vmem:[%s4689_s1 + $0xe0] sm:$0xff] }
  0x1e   : > { %1596 = vmatpush1.bf16.msra.mxu1 %v379_v62  ;;  %v338_v22 = vld [vmem:[%s4689_s1 + $0x2f8] sm:$0xff]  ;;  %v386_v25 = vpack.c.bf16 %v274_v19, %v272_v18  ;;  %v273_v27 = vld [vmem:[%s4689_s1 + $0xf0] sm:$0xff]  ;;  %v335_v28 = vld [vmem:[%s4689_s1 + $0x2e0] sm:$0xff] }
  0x1f   : > { %1949 = vmatpush1.bf16.msra.mxu0 %v411_v63  ;;  %1597 = vmatprep.subr.bf16.mxu1 %v382_v0  ;;  %v418_v29 = vpack.c.bf16 %v338_v22, %v336_v21  ;;  %v337_v30 = vld [vmem:[%s4689_s1 + $0x2f0] sm:$0xff]  ;;  %v276_v31 = vld [vmem:[%s4689_s1 + $0x108] sm:$0xff]  ;;  %v278_v32 = vld [vmem:[%s4689_s1 + $0x118] sm:$0xff]  ;;  %v385_v35 = vpack.c.bf16 %v273_v27, %v271_v26 }
  0x20   : > { %1950 = vmatprep.subr.bf16.mxu0 %v414_v4  ;;  %v340_v33 = vld [vmem:[%s4689_s1 + $0x308] sm:$0xff]  ;;  %v342_v34 = vld [vmem:[%s4689_s1 + $0x318] sm:$0xff]  ;;  %v417_v36 = vpack.c.bf16 %v337_v30, %v335_v28  ;;  %v388_v37 = vpack.c.bf16 %v278_v32, %v276_v31  ;;  %v275_v38 = vld [vmem:[%s4689_s1 + $0x100] sm:$0xff] }
  0x21   : > { %v277_v39 = vld [vmem:[%s4689_s1 + $0x110] sm:$0xff]  ;;  %v339_v40 = vld [vmem:[%s4689_s1 + $0x300] sm:$0xff]  ;;  %v420_v41 = vpack.c.bf16 %v342_v34, %v340_v33  ;;  %v280_v43 = vld [vmem:[%s4689_s1 + $0x128] sm:$0xff] }
  0x22   : > { %1598 = vmatpush1.bf16.msra.mxu1 %v381_v10  ;;  %v341_v42 = vld [vmem:[%s4689_s1 + $0x310] sm:$0xff]  ;;  %v282_v44 = vld [vmem:[%s4689_s1 + $0x138] sm:$0xff]  ;;  %v344_v45 = vld [vmem:[%s4689_s1 + $0x328] sm:$0xff]  ;;  %v387_v47 = vpack.c.bf16 %v277_v39, %v275_v38 }
  0x23   : > { %1951 = vmatpush1.bf16.msra.mxu0 %v413_v11  ;;  %1599 = vmatprep.subr.bf16.mxu1 %v384_v12  ;;  %v346_v46 = vld [vmem:[%s4689_s1 + $0x338] sm:$0xff]  ;;  %v419_v48 = vpack.c.bf16 %v341_v42, %v339_v40  ;;  %v390_v49 = vpack.c.bf16 %v282_v44, %v280_v43  ;;  %v279_v50 = vld [vmem:[%s4689_s1 + $0x120] sm:$0xff]  ;;  %v281_v51 = vld [vmem:[%s4689_s1 + $0x130] sm:$0xff] }
  0x24   : > { %1952 = vmatprep.subr.bf16.mxu0 %v416_v16  ;;  %v343_v52 = vld [vmem:[%s4689_s1 + $0x320] sm:$0xff]  ;;  %v422_v53 = vpack.c.bf16 %v346_v46, %v344_v45  ;;  %v345_v54 = vld [vmem:[%s4689_s1 + $0x330] sm:$0xff]  ;;  %v284_v55 = vld [vmem:[%s4689_s1 + $0x148] sm:$0xff]  ;;  %v389_v59 = vpack.c.bf16 %v281_v51, %v279_v50 }
  0x25   : > { %v286_v56 = vld [vmem:[%s4689_s1 + $0x158] sm:$0xff]  ;;  %v348_v57 = vld [vmem:[%s4689_s1 + $0x348] sm:$0xff]  ;;  %v421_v60 = vpack.c.bf16 %v345_v54, %v343_v52  ;;  %v283_v62 = vld [vmem:[%s4689_s1 + $0x140] sm:$0xff] }
  0x26   : > { %1600 = vmatpush1.bf16.msra.mxu1 %v383_v23  ;;  %v350_v58 = vld [vmem:[%s4689_s1 + $0x358] sm:$0xff]  ;;  %v392_v61 = vpack.c.bf16 %v286_v56, %v284_v55  ;;  %v285_v63 = vld [vmem:[%s4689_s1 + $0x150] sm:$0xff]  ;;  %v347_v0 = vld [vmem:[%s4689_s1 + $0x340] sm:$0xff] }
  0x27   : > { %1953 = vmatpush1.bf16.msra.mxu0 %v415_v24  ;;  %1601 = vmatprep.subr.bf16.mxu1 %v386_v25  ;;  %v424_v1 = vpack.c.bf16 %v350_v58, %v348_v57  ;;  %v349_v2 = vld [vmem:[%s4689_s1 + $0x350] sm:$0xff]  ;;  %v288_v3 = vld [vmem:[%s4689_s1 + $0x168] sm:$0xff]  ;;  %v290_v4 = vld [vmem:[%s4689_s1 + $0x178] sm:$0xff]  ;;  %v391_v7 = vpack.c.bf16 %v285_v63, %v283_v62 }
  0x28   : > { %1954 = vmatprep.subr.bf16.mxu0 %v418_v29  ;;  %v352_v5 = vld [vmem:[%s4689_s1 + $0x368] sm:$0xff]  ;;  %v354_v6 = vld [vmem:[%s4689_s1 + $0x378] sm:$0xff]  ;;  %v287_v8 = vld [vmem:[%s4689_s1 + $0x160] sm:$0xff]  ;;  %v423_v11 = vpack.c.bf16 %v349_v2, %v347_v0  ;;  %v394_v12 = vpack.c.bf16 %v290_v4, %v288_v3 }
  0x29   : > { %v289_v9 = vld [vmem:[%s4689_s1 + $0x170] sm:$0xff]  ;;  %v351_v10 = vld [vmem:[%s4689_s1 + $0x360] sm:$0xff]  ;;  %v292_v14 = vld [vmem:[%s4689_s1 + $0x188] sm:$0xff]  ;;  %v426_v16 = vpack.c.bf16 %v354_v6, %v352_v5 }
  0x2a   : > { %1602 = vmatpush1.bf16.msra.mxu1 %v385_v35  ;;  %v353_v13 = vld [vmem:[%s4689_s1 + $0x370] sm:$0xff]  ;;  %v294_v15 = vld [vmem:[%s4689_s1 + $0x198] sm:$0xff]  ;;  %v356_v17 = vld [vmem:[%s4689_s1 + $0x388] sm:$0xff]  ;;  %v393_v22 = vpack.c.bf16 %v289_v9, %v287_v8 }
  0x2b   : > { %1955 = vmatpush1.bf16.msra.mxu0 %v417_v36  ;;  %1603 = vmatprep.subr.bf16.mxu1 %v388_v37  ;;  %v358_v18 = vld [vmem:[%s4689_s1 + $0x398] sm:$0xff]  ;;  %v291_v19 = vld [vmem:[%s4689_s1 + $0x180] sm:$0xff]  ;;  %v293_v20 = vld [vmem:[%s4689_s1 + $0x190] sm:$0xff]  ;;  %v425_v27 = vpack.c.bf16 %v353_v13, %v351_v10  ;;  %v396_v28 = vpack.c.bf16 %v294_v15, %v292_v14 }
  0x2c   : > { %1956 = vmatprep.subr.bf16.mxu0 %v420_v41  ;;  %v3358_v21 = vld [vmem:[%s3984_s5 + $0x4] ss:$16 sps:$4 sm:$0xff]   ;;  %v296_v25 = vld [vmem:[%s4689_s1 + $0x1a8] sm:$0xff]  ;;  %v298_v26 = vld [vmem:[%s4689_s1 + $0x1b8] sm:$0xff]  ;;  %v428_v30 = vpack.c.bf16 %v358_v18, %v356_v17  ;;  %v395_v35 = vpack.c.bf16 %v293_v20, %v291_v19 }
  0x2d   : > { %v355_v23 = vld [vmem:[%s4689_s1 + $0x380] sm:$0xff]  ;;  %v357_v24 = vld [vmem:[%s4689_s1 + $0x390] sm:$0xff]  ;;  %v3361_v29 = vld [vmem:[%s3984_s5 + $0xc] ss:$16 sps:$4 sm:$0xff]   ;;  %1619 = vmatprep.mubr.bf16.mxu1 %v3358_v21  ;;  %v398_v40 = vpack.c.bf16 %v298_v26, %v296_v25 }
  0x2e   : > { %1604 = vmatpush1.bf16.msra.mxu1 %v387_v47  ;;  %v360_v31 = vld [vmem:[%s4689_s1 + $0x3a8] sm:$0xff]  ;;  %v362_v32 = vld [vmem:[%s4689_s1 + $0x3b8] sm:$0xff]  ;;  %v295_v33 = vld [vmem:[%s4689_s1 + $0x1a0] sm:$0xff]  ;;  %1972 = vmatprep.mubr.bf16.mxu0 %v3361_v29  ;;  %v427_v39 = vpack.c.bf16 %v357_v24, %v355_v23 }
  0x2f   : > { %1957 = vmatpush1.bf16.msra.mxu0 %v419_v48  ;;  %1605 = vmatprep.subr.bf16.mxu1 %v390_v49  ;;  %v297_v34 = vld [vmem:[%s4689_s1 + $0x1b0] sm:$0xff]  ;;  %v359_v36 = vld [vmem:[%s4689_s1 + $0x3a0] sm:$0xff]  ;;  %v300_v38 = vld [vmem:[%s4689_s1 + $0x1c8] sm:$0xff]  ;;  %v430_v42 = vpack.c.bf16 %v362_v32, %v360_v31 }
  0x30   : > { %1958 = vmatprep.subr.bf16.mxu0 %v422_v53  ;;  %v361_v37 = vld [vmem:[%s4689_s1 + $0x3b0] sm:$0xff]  ;;  %v302_v41 = vld [vmem:[%s4689_s1 + $0x1d8] sm:$0xff]  ;;  %v364_v43 = vld [vmem:[%s4689_s1 + $0x3c8] sm:$0xff]  ;;  %v397_v47 = vpack.c.bf16 %v297_v34, %v295_v33 }
  0x31   : > { %v366_v44 = vld [vmem:[%s4689_s1 + $0x3d8] sm:$0xff]  ;;  %v299_v45 = vld [vmem:[%s4689_s1 + $0x1c0] sm:$0xff]  ;;  %v301_v46 = vld [vmem:[%s4689_s1 + $0x1d0] sm:$0xff]  ;;  %v429_v50 = vpack.c.bf16 %v361_v37, %v359_v36  ;;  %v400_v51 = vpack.c.bf16 %v302_v41, %v300_v38 }
  0x32   : > { %1606 = vmatpush1.bf16.msra.mxu1 %v389_v59  ;;  %v363_v48 = vld [vmem:[%s4689_s1 + $0x3c0] sm:$0xff]  ;;  %v365_v49 = vld [vmem:[%s4689_s1 + $0x3d0] sm:$0xff]  ;;  %v304_v52 = vld [vmem:[%s4689_s1 + $0x1e8] sm:$0xff]  ;;  %v432_v53 = vpack.c.bf16 %v366_v44, %v364_v43  ;;  %v399_v57 = vpack.c.bf16 %v301_v46, %v299_v45 }
  0x33   : > { %1959 = vmatpush1.bf16.msra.mxu0 %v421_v60  ;;  %1607 = vmatprep.subr.bf16.mxu1 %v392_v61  ;;  %v306_v54 = vld [vmem:[%s4689_s1 + $0x1f8] sm:$0xff]  ;;  %v368_v55 = vld [vmem:[%s4689_s1 + $0x3e8] sm:$0xff]  ;;  %v303_v58 = vld [vmem:[%s4689_s1 + $0x1e0] sm:$0xff]  ;;  %v431_v59 = vpack.c.bf16 %v365_v49, %v363_v48 }
  0x34   : > { %1960 = vmatprep.subr.bf16.mxu0 %v424_v1  ;;  %v370_v56 = vld [vmem:[%s4689_s1 + $0x3f8] sm:$0xff]  ;;  %v402_v60 = vpack.c.bf16 %v306_v54, %v304_v52  ;;  %v305_v61 = vld [vmem:[%s4689_s1 + $0x1f0] sm:$0xff]  ;;  %v367_v63 = vld [vmem:[%s4689_s1 + $0x3e0] sm:$0xff] }
  0x35   : > { %v434_v62 = vpack.c.bf16 %v370_v56, %v368_v55  ;;  %v369_v0 = vld [vmem:[%s4689_s1 + $0x3f0] sm:$0xff]  ;;  %v401_v1 = vpack.c.bf16 %v305_v61, %v303_v58  ;;  %v3359_v4 = vld [vmem:[%s3984_s5 + $0x8] ss:$16 sps:$4 sm:$0xff]   ;;  %v3364_v6 = vld [vmem:[%s3984_s5 + $0x2c] ss:$16 sps:$4 sm:$0xff]  }
  0x36   : > { %1608 = vmatpush1.bf16.msra.mxu1 %v391_v7  ;;  %v433_v2 = vpack.c.bf16 %v369_v0, %v367_v63  ;;  %v3356_v3 = vld [vmem:[%s3984_s5] ss:$16 sps:$4 sm:$0xff]   ;;  %v3362_v5 = vld [vmem:[%s3984_s5 + $0x24] ss:$16 sps:$4 sm:$0xff]   ;;  %v3367_v8 = vld [vmem:[%s3984_s5 + $0x28] ss:$16 sps:$4 sm:$0xff]  }
  0x37   : > { %1961 = vmatpush1.bf16.msra.mxu0 %v423_v11  ;;  %1609 = vmatprep.subr.bf16.mxu1 %v394_v12  ;;  %v3366_v7 = vld [vmem:[%s3984_s5 + $0x20] ss:$16 sps:$4 sm:$0xff]   ;;  %v3368_v9 = vld [vmem:[%s3984_s5 + $0x44] ss:$16 sps:$4 sm:$0xff]   ;;  %v3370_v12 = vld [vmem:[%s3984_s5 + $0x4c] ss:$16 sps:$4 sm:$0xff]  }
  0x38   : > { %1962 = vmatprep.subr.bf16.mxu0 %v426_v16  ;;  %v563_v10 = vld [vmem:[%s4095_s28] sm:$0xff]  ;;  %v565_v11 = vld [vmem:[%s4095_s28 + $0x10] sm:$0xff]  ;;  %v564_v13 = vld [vmem:[%s4095_s28 + $0x8] sm:$0xff] }
  0x39   : > { %629 = vperm.xlu0 %3354, %v563_v10   ;;  %639 = vperm.xlu1 %3355, %v565_v11   ;;  %v566_v14 = vld [vmem:[%s4095_s28 + $0x18] sm:$0xff]  ;;  %v567_v15 = vld [vmem:[%s4095_s28 + $0x20] sm:$0xff]  ;;  %v568_v17 = vld [vmem:[%s4095_s28 + $0x28] sm:$0xff] }
  0x3a   : > { %1610 = vmatpush1.bf16.msra.mxu1 %v393_v22  ;;  %v3372_v16 = vld [vmem:[%s3984_s5 + $0x40] ss:$16 sps:$4 sm:$0xff]   ;;  %v3373_v18 = vld [vmem:[%s3984_s5 + $0x48] ss:$16 sps:$4 sm:$0xff]   ;;  %v3374_v19 = vld [vmem:[%s3984_s5 + $0x64] ss:$16 sps:$4 sm:$0xff]  }
  0x3b   : > { %1963 = vmatpush1.bf16.msra.mxu0 %v425_v27  ;;  %1611 = vmatprep.subr.bf16.mxu1 %v396_v28  ;;  %v3376_v20 = vld [vmem:[%s3984_s5 + $0x6c] ss:$16 sps:$4 sm:$0xff]   ;;  %v569_v21 = vld [vmem:[%s4095_s28 + $0x30] sm:$0xff]  ;;  %v571_v23 = vld [vmem:[%s4095_s28 + $0x40] sm:$0xff] }
  0x3c   : > { %1964 = vmatprep.subr.bf16.mxu0 %v428_v30  ;;  %v570_v22 = vld [vmem:[%s4095_s28 + $0x38] sm:$0xff]  ;;  %v3378_v24 = vld [vmem:[%s3984_s5 + $0x60] ss:$16 sps:$4 sm:$0xff]   ;;  %v572_v25 = vld [vmem:[%s4095_s28 + $0x48] sm:$0xff] }
  0x3d   : > { %634 = vperm.xlu0 %3354, %v564_v13   ;;  %644 = vperm.xlu1 %3355, %v566_v14   ;;  %v3379_v26 = vld [vmem:[%s3984_s5 + $0x68] ss:$16 sps:$4 sm:$0xff]   ;;  %v3380_v27 = vld [vmem:[%s3984_s5 + $0x84] ss:$16 sps:$4 sm:$0xff]   ;;  %v3382_v28 = vld [vmem:[%s3984_s5 + $0x8c] ss:$16 sps:$4 sm:$0xff]  }
  0x3e   : > { %1612 = vmatpush1.bf16.msra.mxu1 %v395_v35  ;;  %v573_v29 = vld [vmem:[%s4095_s28 + $0x50] sm:$0xff]  ;;  %v574_v30 = vld [vmem:[%s4095_s28 + $0x58] sm:$0xff]  ;;  %v575_v31 = vld [vmem:[%s4095_s28 + $0x60] sm:$0xff] }
  0x3f   : > { %1965 = vmatpush1.bf16.msra.mxu0 %v427_v39  ;;  %1613 = vmatprep.subr.bf16.mxu1 %v398_v40  ;;  %v3384_v32 = vld [vmem:[%s3984_s5 + $0x80] ss:$16 sps:$4 sm:$0xff]   ;;  %v576_v33 = vld [vmem:[%s4095_s28 + $0x68] sm:$0xff]  ;;  %v3386_v35 = vld [vmem:[%s3984_s5 + $0xa4] ss:$16 sps:$4 sm:$0xff]  }
  0x40   : > { %1966 = vmatprep.subr.bf16.mxu0 %v430_v42  ;;  %v3385_v34 = vld [vmem:[%s3984_s5 + $0x88] ss:$16 sps:$4 sm:$0xff]   ;;  %v3388_v36 = vld [vmem:[%s3984_s5 + $0xac] ss:$16 sps:$4 sm:$0xff]   ;;  %v577_v37 = vld [vmem:[%s4095_s28 + $0x70] sm:$0xff] }
  0x41   : > { %649 = vperm.xlu0 %3354, %v567_v15   ;;  %654 = vperm.xlu1 %3355, %v568_v17   ;;  %v578_v38 = vld [vmem:[%s4095_s28 + $0x78] sm:$0xff]  ;;  %v579_v39 = vld [vmem:[%s4095_s28 + $0x80] sm:$0xff]  ;;  %v580_v41 = vld [vmem:[%s4095_s28 + $0x88] sm:$0xff] }
  0x42   : > { %1614 = vmatpush1.bf16.msra.mxu1 %v397_v47  ;;  %v3390_v40 = vld [vmem:[%s3984_s5 + $0xa0] ss:$16 sps:$4 sm:$0xff]   ;;  %v3391_v42 = vld [vmem:[%s3984_s5 + $0xa8] ss:$16 sps:$4 sm:$0xff]   ;;  %v3392_v43 = vld [vmem:[%s3984_s5 + $0xc4] ss:$16 sps:$4 sm:$0xff]  }
  0x43   : > { %1967 = vmatpush1.bf16.msra.mxu0 %v429_v50  ;;  %1615 = vmatprep.subr.bf16.mxu1 %v400_v51  ;;  %v3394_v44 = vld [vmem:[%s3984_s5 + $0xcc] ss:$16 sps:$4 sm:$0xff]   ;;  %v581_v45 = vld [vmem:[%s4095_s28 + $0x90] sm:$0xff]  ;;  %v583_v47 = vld [vmem:[%s4095_s28 + $0xa0] sm:$0xff] }
  0x44   : > { %1968 = vmatprep.subr.bf16.mxu0 %v432_v53  ;;  %v582_v46 = vld [vmem:[%s4095_s28 + $0x98] sm:$0xff]  ;;  %v3396_v48 = vld [vmem:[%s3984_s5 + $0xc0] ss:$16 sps:$4 sm:$0xff]   ;;  %v584_v49 = vld [vmem:[%s4095_s28 + $0xa8] sm:$0xff] }
  0x45   : > { %659 = vperm.xlu0 %3354, %v569_v21   ;;  %664 = vperm.xlu1 %3355, %v570_v22   ;;  %v3397_v50 = vld [vmem:[%s3984_s5 + $0xc8] ss:$16 sps:$4 sm:$0xff]   ;;  %v3398_v51 = vld [vmem:[%s3984_s5 + $0xe4] ss:$16 sps:$4 sm:$0xff]   ;;  %v3400_v52 = vld [vmem:[%s3984_s5 + $0xec] ss:$16 sps:$4 sm:$0xff]  }
  0x46   : > { %1616 = vmatpush1.bf16.msra.mxu1 %v399_v57  ;;  %v585_v53 = vld [vmem:[%s4095_s28 + $0xb0] sm:$0xff]  ;;  %v586_v54 = vld [vmem:[%s4095_s28 + $0xb8] sm:$0xff]  ;;  %v587_v55 = vld [vmem:[%s4095_s28 + $0xc0] sm:$0xff] }
  0x47   : > { %1969 = vmatpush1.bf16.msra.mxu0 %v431_v59  ;;  %1617 = vmatprep.subr.bf16.mxu1 %v402_v60  ;;  %v3402_v56 = vld [vmem:[%s3984_s5 + $0xe0] ss:$16 sps:$4 sm:$0xff]   ;;  %v588_v57 = vld [vmem:[%s4095_s28 + $0xc8] sm:$0xff]  ;;  %v3404_v59 = vld [vmem:[%s3984_s5 + $0x104] ss:$16 sps:$4 sm:$0xff]  }
  0x48   : > { %1970 = vmatprep.subr.bf16.mxu0 %v434_v62  ;;  %v3403_v58 = vld [vmem:[%s3984_s5 + $0xe8] ss:$16 sps:$4 sm:$0xff]   ;;  %v3406_v60 = vld [vmem:[%s3984_s5 + $0x10c] ss:$16 sps:$4 sm:$0xff]   ;;  %v589_v61 = vld [vmem:[%s4095_s28 + $0xd0] sm:$0xff] }
  0x49   : > { %669 = vperm.xlu0 %3354, %v571_v23   ;;  %674 = vperm.xlu1 %3355, %v572_v25   ;;  %v590_v62 = vld [vmem:[%s4095_s28 + $0xd8] sm:$0xff]  ;;  %v3408_v63 = vld [vmem:[%s3984_s5 + $0x100] ss:$16 sps:$4 sm:$0xff]   ;;  %v3416_v10 = vld [vmem:[%s3984_s5 + $0x144] ss:$16 sps:$4 sm:$0xff]  }
  0x4a   : > { %1618 = vmatpush1.bf16.msra.mxu1 %v401_v1  ;;  %v3409_v0 = vld [vmem:[%s3984_s5 + $0x108] ss:$16 sps:$4 sm:$0xff]   ;;  %v3410_v1 = vld [vmem:[%s3984_s5 + $0x124] ss:$16 sps:$4 sm:$0xff]  }
  0x4b   : > { %1971 = vmatpush1.bf16.msra.mxu0 %v433_v2  ;;  %v592_v2 = vld [vmem:[%s4095_s28 + $0xe8] sm:$0xff]  ;;  %v595_v11 = vld [vmem:[%s4095_s28 + $0x100] sm:$0xff]  ;;  %v597_v13 = vld [vmem:[%s4095_s28 + $0x110] sm:$0xff] }
  0x4c   : > { %v598_v14 = vld [vmem:[%s4095_s28 + $0x118] sm:$0xff]  ;;  %v599_v15 = vld [vmem:[%s4095_s28 + $0x120] sm:$0xff]  ;;  %v600_v17 = vld [vmem:[%s4095_s28 + $0x128] sm:$0xff] }
  0x4d   : > { %1620 = vmatmul.mubr.bf16.vlgmr.msra.gmra.mrb[0].mxu1 %v3356_v3  ;;  %679 = vperm.xlu0 %3354, %v573_v29   ;;  %v591_v3 = vld [vmem:[%s4095_s28 + $0xe0] sm:$0xff]  ;;  %v601_v21 = vld [vmem:[%s4095_s28 + $0x130] sm:$0xff]  ;;  %v602_v22 = vld [vmem:[%s4095_s28 + $0x138] sm:$0xff] }
  0x4e   : > { %1973 = vmatmul.mubr.bf16.vlgmr.msra.gmra.mrb[0].mxu0 %v3359_v4  ;;  %1629 = vmatprep.mubr.bf16.mxu1 %v3362_v5  ;;  %v3412_v4 = vld [vmem:[%s3984_s5 + $0x12c] ss:$16 sps:$4 sm:$0xff]   ;;  %v603_v23 = vld [vmem:[%s4095_s28 + $0x140] sm:$0xff]  ;;  %v605_v29 = vld [vmem:[%s4095_s28 + $0x150] sm:$0xff] }
  0x4f   : > { %1982 = vmatprep.mubr.bf16.mxu0 %v3364_v6  ;;  %684 = vperm.xlu1 %3355, %v574_v30   ;;  %v594_v5 = vld [vmem:[%s4095_s28 + $0xf8] sm:$0xff]  ;;  %v593_v6 = vld [vmem:[%s4095_s28 + $0xf0] sm:$0xff]  ;;  %v604_v25 = vld [vmem:[%s4095_s28 + $0x148] sm:$0xff] }
  0x50   : > { %v606_v30 = vld [vmem:[%s4095_s28 + $0x158] sm:$0xff] }
  0x51   : > { %689 = vperm.xlu0 %3354, %v575_v31   ;;  %v607_v31 = vld [vmem:[%s4095_s28 + $0x160] sm:$0xff] }
  0x53   : > { %694 = vperm.xlu1 %3355, %v576_v33   ;;  %v608_v33 = vld [vmem:[%s4095_s28 + $0x168] sm:$0xff] }
  0x55   : > { %1630 = vmatmul.mubr.bf16.gmra.mrb[4].mxu1 %v3366_v7  ;;  %699 = vperm.xlu0 %3354, %v577_v37   ;;  %v3414_v7 = vld [vmem:[%s3984_s5 + $0x120] ss:$16 sps:$4 sm:$0xff]  }
  0x56   : > { %1983 = vmatmul.mubr.bf16.gmra.mrb[4].mxu0 %v3367_v8  ;;  %1639 = vmatprep.mubr.bf16.mxu1 %v3368_v9  ;;  %v596_v8 = vld [vmem:[%s4095_s28 + $0x108] sm:$0xff]  ;;  %v609_v37 = vld [vmem:[%s4095_s28 + $0x170] sm:$0xff] }
  0x57   : > { %1992 = vmatprep.mubr.bf16.mxu0 %v3370_v12  ;;  %704 = vperm.xlu1 %3355, %v578_v38   ;;  %v3415_v9 = vld [vmem:[%s3984_s5 + $0x128] ss:$16 sps:$4 sm:$0xff]   ;;  %v3418_v12 = vld [vmem:[%s3984_s5 + $0x14c] ss:$16 sps:$4 sm:$0xff]  }
  0x58   : > { %v610_v38 = vld [vmem:[%s4095_s28 + $0x178] sm:$0xff] }
  0x59   : > { %709 = vperm.xlu0 %3354, %v579_v39   ;;  %v611_v39 = vld [vmem:[%s4095_s28 + $0x180] sm:$0xff] }
  0x5b   : > { %714 = vperm.xlu1 %3355, %v580_v41   ;;  %v612_v41 = vld [vmem:[%s4095_s28 + $0x188] sm:$0xff] }
  0x5d   : > { %1640 = vmatmul.mubr.bf16.gmra.mrb[8].mxu1 %v3372_v16  ;;  %719 = vperm.xlu0 %3354, %v581_v45   ;;  %v3420_v16 = vld [vmem:[%s3984_s5 + $0x140] ss:$16 sps:$4 sm:$0xff]  }
  0x5e   : > { %1993 = vmatmul.mubr.bf16.gmra.mrb[8].mxu0 %v3373_v18  ;;  %1649 = vmatprep.mubr.bf16.mxu1 %v3374_v19  ;;  %v3421_v18 = vld [vmem:[%s3984_s5 + $0x148] ss:$16 sps:$4 sm:$0xff]   ;;  %v3422_v19 = vld [vmem:[%s3984_s5 + $0x164] ss:$16 sps:$4 sm:$0xff]  }
  0x5f   : > { %2002 = vmatprep.mubr.bf16.mxu0 %v3376_v20  ;;  %724 = vperm.xlu1 %3355, %v582_v46   ;;  %v3424_v20 = vld [vmem:[%s3984_s5 + $0x16c] ss:$16 sps:$4 sm:$0xff]   ;;  %v613_v45 = vld [vmem:[%s4095_s28 + $0x190] sm:$0xff] }
  0x60   : > { %v614_v46 = vld [vmem:[%s4095_s28 + $0x198] sm:$0xff] }
  0x61   : > { %729 = vperm.xlu0 %3354, %v583_v47   ;;  %v615_v47 = vld [vmem:[%s4095_s28 + $0x1a0] sm:$0xff] }
  0x63   : > { %734 = vperm.xlu1 %3355, %v584_v49   ;;  %v616_v49 = vld [vmem:[%s4095_s28 + $0x1a8] sm:$0xff] }
  0x65   : > { %1650 = vmatmul.mubr.bf16.gmra.mrb[12].mxu1 %v3378_v24  ;;  %739 = vperm.xlu0 %3354, %v585_v53   ;;  %v3426_v24 = vld [vmem:[%s3984_s5 + $0x160] ss:$16 sps:$4 sm:$0xff]  }
  0x66   : > { %2003 = vmatmul.mubr.bf16.gmra.mrb[12].mxu0 %v3379_v26  ;;  %1659 = vmatprep.mubr.bf16.mxu1 %v3380_v27  ;;  %v3427_v26 = vld [vmem:[%s3984_s5 + $0x168] ss:$16 sps:$4 sm:$0xff]   ;;  %v3428_v27 = vld [vmem:[%s3984_s5 + $0x184] ss:$16 sps:$4 sm:$0xff]  }
  0x67   : > { %2012 = vmatprep.mubr.bf16.mxu0 %v3382_v28  ;;  %744 = vperm.xlu1 %3355, %v586_v54   ;;  %v3430_v28 = vld [vmem:[%s3984_s5 + $0x18c] ss:$16 sps:$4 sm:$0xff]   ;;  %v617_v53 = vld [vmem:[%s4095_s28 + $0x1b0] sm:$0xff] }
  0x68   : > { %v618_v54 = vld [vmem:[%s4095_s28 + $0x1b8] sm:$0xff] }
  0x69   : > { %749 = vperm.xlu0 %3354, %v587_v55   ;;  %v619_v55 = vld [vmem:[%s4095_s28 + $0x1c0] sm:$0xff] }
  0x6b   : > { %754 = vperm.xlu1 %3355, %v588_v57   ;;  %v620_v57 = vld [vmem:[%s4095_s28 + $0x1c8] sm:$0xff] }
  0x6d   : > { %1660 = vmatmul.mubr.bf16.gmra.mrb[16].mxu1 %v3384_v32  ;;  %759 = vperm.xlu0 %3354, %v589_v61   ;;  %v3432_v32 = vld [vmem:[%s3984_s5 + $0x180] ss:$16 sps:$4 sm:$0xff]  }
  0x6e   : > { %2013 = vmatmul.mubr.bf16.gmra.mrb[16].mxu0 %v3385_v34  ;;  %1669 = vmatprep.mubr.bf16.mxu1 %v3386_v35  ;;  %v3433_v34 = vld [vmem:[%s3984_s5 + $0x188] ss:$16 sps:$4 sm:$0xff]   ;;  %v3434_v35 = vld [vmem:[%s3984_s5 + $0x1a4] ss:$16 sps:$4 sm:$0xff]  }
  0x6f   : > { %2022 = vmatprep.mubr.bf16.mxu0 %v3388_v36  ;;  %764 = vperm.xlu1 %3355, %v590_v62   ;;  %v3436_v36 = vld [vmem:[%s3984_s5 + $0x1ac] ss:$16 sps:$4 sm:$0xff]   ;;  %v621_v61 = vld [vmem:[%s4095_s28 + $0x1d0] sm:$0xff] }
  0x70   : > { %v622_v62 = vld [vmem:[%s4095_s28 + $0x1d8] sm:$0xff] }
  0x71   : > { %769 = vperm.xlu0 %3354, %v591_v3   ;;  %v3458_v3 = vld [vmem:[%s3984_s5 + $0x224] ss:$16 sps:$4 sm:$0xff]  }
  0x73   : > { %774 = vperm.xlu1 %3355, %v592_v2   ;;  %v3457_v2 = vld [vmem:[%s3984_s5 + $0x208] ss:$16 sps:$4 sm:$0xff]  }
  0x75   : > { %1670 = vmatmul.mubr.bf16.gmra.mrb[20].mxu1 %v3390_v40  ;;  %779 = vperm.xlu0 %3354, %v593_v6   ;;  %v3438_v40 = vld [vmem:[%s3984_s5 + $0x1a0] ss:$16 sps:$4 sm:$0xff]   ;;  %v626_v6 = vld [vmem:[%s4095_s28 + $0x1f8] sm:$0xff] }
  0x76   : > { %2023 = vmatmul.mubr.bf16.gmra.mrb[20].mxu0 %v3391_v42  ;;  %1679 = vmatprep.mubr.bf16.mxu1 %v3392_v43  ;;  %v3439_v42 = vld [vmem:[%s3984_s5 + $0x1a8] ss:$16 sps:$4 sm:$0xff]   ;;  %v3440_v43 = vld [vmem:[%s3984_s5 + $0x1c4] ss:$16 sps:$4 sm:$0xff]  }
  0x77   : > { %2032 = vmatprep.mubr.bf16.mxu0 %v3394_v44  ;;  %784 = vperm.xlu1 %3355, %v594_v5   ;;  %v3442_v44 = vld [vmem:[%s3984_s5 + $0x1cc] ss:$16 sps:$4 sm:$0xff]   ;;  %v625_v5 = vld [vmem:[%s4095_s28 + $0x1f0] sm:$0xff] }
  0x79   : > { %789 = vperm.xlu0 %3354, %v595_v11   ;;  %v3468_v11 = vld [vmem:[%s3984_s5 + $0x240] ss:$16 sps:$4 sm:$0xff]  }
  0x7b   : > { %794 = vperm.xlu1 %3355, %v596_v8   ;;  %v3463_v8 = vld [vmem:[%s3984_s5 + $0x228] ss:$16 sps:$4 sm:$0xff]  }
  0x7d   : > { %1680 = vmatmul.mubr.bf16.gmra.mrb[24].mxu1 %v3396_v48  ;;  %799 = vperm.xlu0 %3354, %v597_v13   ;;  %v3444_v48 = vld [vmem:[%s3984_s5 + $0x1c0] ss:$16 sps:$4 sm:$0xff]   ;;  %v3470_v13 = vld [vmem:[%s3984_s5 + $0x264] ss:$16 sps:$4 sm:$0xff]  }
  0x7e   : > { %2033 = vmatmul.mubr.bf16.gmra.mrb[24].mxu0 %v3397_v50  ;;  %1689 = vmatprep.mubr.bf16.mxu1 %v3398_v51  ;;  %v3445_v50 = vld [vmem:[%s3984_s5 + $0x1c8] ss:$16 sps:$4 sm:$0xff]   ;;  %v3446_v51 = vld [vmem:[%s3984_s5 + $0x1e4] ss:$16 sps:$4 sm:$0xff]  }
  0x7f   : > { %2042 = vmatprep.mubr.bf16.mxu0 %v3400_v52  ;;  %804 = vperm.xlu1 %3355, %v598_v14   ;;  %v3448_v52 = vld [vmem:[%s3984_s5 + $0x1ec] ss:$16 sps:$4 sm:$0xff]  }
  0x80   : > { %v3472_v14 = vld [vmem:[%s3984_s5 + $0x26c] ss:$16 sps:$4 sm:$0xff]  }
  0x81   : > { %809 = vperm.xlu0 %3354, %v599_v15   ;;  %v3474_v15 = vld [vmem:[%s3984_s5 + $0x260] ss:$16 sps:$4 sm:$0xff]  }
  0x83   : > { %814 = vperm.xlu1 %3355, %v600_v17   ;;  %v3476_v17 = vld [vmem:[%s3984_s5 + $0x284] ss:$16 sps:$4 sm:$0xff]  }
  0x85   : > { %1690 = vmatmul.mubr.bf16.gmra.mrb[28].mxu1 %v3402_v56  ;;  %819 = vperm.xlu0 %3354, %v601_v21   ;;  %v3450_v56 = vld [vmem:[%s3984_s5 + $0x1e0] ss:$16 sps:$4 sm:$0xff]   ;;  %v3482_v21 = vld [vmem:[%s3984_s5 + $0x2a4] ss:$16 sps:$4 sm:$0xff]  }
  0x86   : > { %2043 = vmatmul.mubr.bf16.gmra.mrb[28].mxu0 %v3403_v58  ;;  %1699 = vmatprep.mubr.bf16.mxu1 %v3404_v59  ;;  %v3451_v58 = vld [vmem:[%s3984_s5 + $0x1e8] ss:$16 sps:$4 sm:$0xff]   ;;  %v3452_v59 = vld [vmem:[%s3984_s5 + $0x204] ss:$16 sps:$4 sm:$0xff]  }
  0x87   : > { %2052 = vmatprep.mubr.bf16.mxu0 %v3406_v60  ;;  %824 = vperm.xlu1 %3355, %v602_v22   ;;  %v3454_v60 = vld [vmem:[%s3984_s5 + $0x20c] ss:$16 sps:$4 sm:$0xff]  }
  0x88   : > { %v3484_v22 = vld [vmem:[%s3984_s5 + $0x2ac] ss:$16 sps:$4 sm:$0xff]  }
  0x89   : > { %829 = vperm.xlu0 %3354, %v603_v23   ;;  %v3486_v23 = vld [vmem:[%s3984_s5 + $0x2a0] ss:$16 sps:$4 sm:$0xff]  }
  0x8b   : > { %834 = vperm.xlu1 %3355, %v604_v25   ;;  %v3488_v25 = vld [vmem:[%s3984_s5 + $0x2c4] ss:$16 sps:$4 sm:$0xff]  }
  0x8d   : > { %1700 = vmatmul.mubr.bf16.gmra.mrb[32].mxu1 %v3408_v63  ;;  %839 = vperm.xlu0 %3354, %v605_v29   ;;  %v623_v63 = vld [vmem:[%s4095_s28 + $0x1e0] sm:$0xff] }
  0x8e   : > { %2053 = vmatmul.mubr.bf16.gmra.mrb[32].mxu0 %v3409_v0  ;;  %1709 = vmatprep.mubr.bf16.mxu1 %v3410_v1  ;;  %v3456_v0 = vld [vmem:[%s3984_s5 + $0x200] ss:$16 sps:$4 sm:$0xff]   ;;  %v624_v1 = vld [vmem:[%s4095_s28 + $0x1e8] sm:$0xff]  ;;  %v3494_v29 = vld [vmem:[%s3984_s5 + $0x2e4] ss:$16 sps:$4 sm:$0xff]  }
  0x8f   : > { %2062 = vmatprep.mubr.bf16.mxu0 %v3412_v4  ;;  %844 = vperm.xlu1 %3355, %v606_v30   ;;  %v3460_v4 = vld [vmem:[%s3984_s5 + $0x22c] ss:$16 sps:$4 sm:$0xff]  }
  0x90   : > { %v3496_v30 = vld [vmem:[%s3984_s5 + $0x2ec] ss:$16 sps:$4 sm:$0xff]  }
  0x91   : > { %849 = vperm.xlu0 %3354, %v607_v31   ;;  %v3498_v31 = vld [vmem:[%s3984_s5 + $0x2e0] ss:$16 sps:$4 sm:$0xff]  }
  0x93   : > { %854 = vperm.xlu1 %3355, %v608_v33   ;;  %v3500_v33 = vld [vmem:[%s3984_s5 + $0x304] ss:$16 sps:$4 sm:$0xff]  }
  0x95   : > { %1710 = vmatmul.mubr.bf16.gmra.mrb[36].mxu1 %v3414_v7  ;;  %859 = vperm.xlu0 %3354, %v609_v37   ;;  %v3462_v7 = vld [vmem:[%s3984_s5 + $0x220] ss:$16 sps:$4 sm:$0xff]   ;;  %v3506_v37 = vld [vmem:[%s3984_s5 + $0x324] ss:$16 sps:$4 sm:$0xff]  }
  0x96   : > { %2063 = vmatmul.mubr.bf16.gmra.mrb[36].mxu0 %v3415_v9  ;;  %1719 = vmatprep.mubr.bf16.mxu1 %v3416_v10  ;;  %v3464_v9 = vld [vmem:[%s3984_s5 + $0x244] ss:$16 sps:$4 sm:$0xff]   ;;  %v3466_v10 = vld [vmem:[%s3984_s5 + $0x24c] ss:$16 sps:$4 sm:$0xff]  }
  0x97   : > { %2072 = vmatprep.mubr.bf16.mxu0 %v3418_v12  ;;  %864 = vperm.xlu1 %3355, %v610_v38   ;;  %v3469_v12 = vld [vmem:[%s3984_s5 + $0x248] ss:$16 sps:$4 sm:$0xff]   ;;  %v3508_v38 = vld [vmem:[%s3984_s5 + $0x32c] ss:$16 sps:$4 sm:$0xff]  }
  0x99   : > { %869 = vperm.xlu0 %3354, %v611_v39   ;;  %v3510_v39 = vld [vmem:[%s3984_s5 + $0x320] ss:$16 sps:$4 sm:$0xff]  }
  0x9b   : > { %874 = vperm.xlu1 %3355, %v612_v41   ;;  %v3512_v41 = vld [vmem:[%s3984_s5 + $0x344] ss:$16 sps:$4 sm:$0xff]  }
  0x9d   : > { %1720 = vmatmul.mubr.bf16.gmra.mrb[40].mxu1 %v3420_v16  ;;  %879 = vperm.xlu0 %3354, %v613_v45   ;;  %v3475_v16 = vld [vmem:[%s3984_s5 + $0x268] ss:$16 sps:$4 sm:$0xff]  }
  0x9e   : > { %2073 = vmatmul.mubr.bf16.gmra.mrb[40].mxu0 %v3421_v18  ;;  %1729 = vmatprep.mubr.bf16.mxu1 %v3422_v19  ;;  %v3478_v18 = vld [vmem:[%s3984_s5 + $0x28c] ss:$16 sps:$4 sm:$0xff]   ;;  %v3480_v19 = vld [vmem:[%s3984_s5 + $0x280] ss:$16 sps:$4 sm:$0xff]  }
  0x9f   : > { %2082 = vmatprep.mubr.bf16.mxu0 %v3424_v20  ;;  %884 = vperm.xlu1 %3355, %v614_v46   ;;  %v3481_v20 = vld [vmem:[%s3984_s5 + $0x288] ss:$16 sps:$4 sm:$0xff]   ;;  %v3518_v46 = vld [vmem:[%s3984_s5 + $0x364] ss:$16 sps:$4 sm:$0xff]  }
  0xa1   : > { %889 = vperm.xlu0 %3354, %v615_v47   ;;  %v3520_v47 = vld [vmem:[%s3984_s5 + $0x36c] ss:$16 sps:$4 sm:$0xff]  }
  0xa3   : > { %894 = vperm.xlu1 %3355, %v616_v49  }
  0xa5   : > { %1730 = vmatmul.mubr.bf16.gmra.mrb[44].mxu1 %v3426_v24  ;;  %899 = vperm.xlu0 %3354, %v617_v53   ;;  %v3487_v24 = vld [vmem:[%s3984_s5 + $0x2a8] ss:$16 sps:$4 sm:$0xff]  }
  0xa6   : > { %2083 = vmatmul.mubr.bf16.gmra.mrb[44].mxu0 %v3427_v26  ;;  %1739 = vmatprep.mubr.bf16.mxu1 %v3428_v27  ;;  %v3490_v26 = vld [vmem:[%s3984_s5 + $0x2cc] ss:$16 sps:$4 sm:$0xff]   ;;  %v3492_v27 = vld [vmem:[%s3984_s5 + $0x2c0] ss:$16 sps:$4 sm:$0xff]  }
  0xa7   : > { %2092 = vmatprep.mubr.bf16.mxu0 %v3430_v28  ;;  %904 = vperm.xlu1 %3355, %v618_v54   ;;  %v3493_v28 = vld [vmem:[%s3984_s5 + $0x2c8] ss:$16 sps:$4 sm:$0xff]   ;;  %v3522_v54 = vld [vmem:[%s3984_s5 + $0x360] ss:$16 sps:$4 sm:$0xff]  }
  0xa9   : > { %909 = vperm.xlu0 %3354, %v619_v55  }
  0xab   : > { %914 = vperm.xlu1 %3355, %v620_v57  }
  0xad   : > { %1740 = vmatmul.mubr.bf16.gmra.mrb[48].mxu1 %v3432_v32  ;;  %919 = vperm.xlu0 %3354, %v621_v61   ;;  %v3499_v32 = vld [vmem:[%s3984_s5 + $0x2e8] ss:$16 sps:$4 sm:$0xff]  }
  0xae   : > { %2093 = vmatmul.mubr.bf16.gmra.mrb[48].mxu0 %v3433_v34  ;;  %1749 = vmatprep.mubr.bf16.mxu1 %v3434_v35  ;;  %v3502_v34 = vld [vmem:[%s3984_s5 + $0x30c] ss:$16 sps:$4 sm:$0xff]   ;;  %v3504_v35 = vld [vmem:[%s3984_s5 + $0x300] ss:$16 sps:$4 sm:$0xff]  }
  0xaf   : > { %2102 = vmatprep.mubr.bf16.mxu0 %v3436_v36  ;;  %924 = vperm.xlu1 %3355, %v622_v62   ;;  %v3505_v36 = vld [vmem:[%s3984_s5 + $0x308] ss:$16 sps:$4 sm:$0xff]  }
  0xb1   : > { %929 = vperm.xlu0 %3354, %v623_v63  }
  0xb3   : > { %934 = vperm.xlu1 %3355, %v624_v1  }
  0xb5   : > { %1750 = vmatmul.mubr.bf16.gmra.mrb[52].mxu1 %v3438_v40  ;;  %939 = vperm.xlu0 %3354, %v625_v5   ;;  %v3511_v40 = vld [vmem:[%s3984_s5 + $0x328] ss:$16 sps:$4 sm:$0xff]  }
  0xb6   : > { %2103 = vmatmul.mubr.bf16.gmra.mrb[52].mxu0 %v3439_v42  ;;  %1759 = vmatprep.mubr.bf16.mxu1 %v3440_v43  ;;  %v3514_v42 = vld [vmem:[%s3984_s5 + $0x34c] ss:$16 sps:$4 sm:$0xff]   ;;  %v3516_v43 = vld [vmem:[%s3984_s5 + $0x340] ss:$16 sps:$4 sm:$0xff]  }
  0xb7   : > { %2112 = vmatprep.mubr.bf16.mxu0 %v3442_v44  ;;  %944 = vperm.xlu1 %3355, %v626_v6   ;;  %v3517_v44 = vld [vmem:[%s3984_s5 + $0x348] ss:$16 sps:$4 sm:$0xff]  }
  0xb8   : > { %v630_v45 = vpop.permute.xlu0 %629 }
  0xbd   : > { %1760 = vmatmul.mubr.bf16.gmra.mrb[56].mxu1 %v3444_v48  ;;  %v640_v48 = vpop.permute.xlu1 %639 }
  0xbe   : > { %2113 = vmatmul.mubr.bf16.gmra.mrb[56].mxu0 %v3445_v50  ;;  %1769 = vmatprep.mubr.bf16.mxu1 %v3446_v51  ;;  %v635_v50 = vpop.permute.xlu0 %634 }
  0xbf   : > { %2122 = vmatprep.mubr.bf16.mxu0 %v3448_v52 }
  0xc5   : > { %1770 = vmatmul.mubr.bf16.gmra.mrb[60].mxu1 %v3450_v56 }
  0xc6   : > { %2123 = vmatmul.mubr.bf16.gmra.mrb[60].mxu0 %v3451_v58  ;;  %1779 = vmatprep.mubr.bf16.mxu1 %v3452_v59  ;;  %v3523_v58 = vld [vmem:[%s3984_s5 + $0x368] ss:$16 sps:$4 sm:$0xff]   ;;  %v3524_v59 = vld [vmem:[%s3984_s5 + $0x384] ss:$16 sps:$4 sm:$0xff]  }
  0xc7   : > { %2132 = vmatprep.mubr.bf16.mxu0 %v3454_v60 }
  0xcd   : > { %1780 = vmatmul.mubr.bf16.gmra.mrb[64].mxu1 %v3456_v0  ;;  %v3526_v0 = vld [vmem:[%s3984_s5 + $0x38c] ss:$16 sps:$4 sm:$0xff]  }
  0xce   : > { %2133 = vmatmul.mubr.bf16.gmra.mrb[64].mxu0 %v3457_v2  ;;  %1789 = vmatprep.mubr.bf16.mxu1 %v3458_v3 }
  0xcf   : > { %2142 = vmatprep.mubr.bf16.mxu0 %v3460_v4 }
  0xd5   : > { %1790 = vmatmul.mubr.bf16.gmra.mrb[68].mxu1 %v3462_v7 }
  0xd6   : > { %2143 = vmatmul.mubr.bf16.gmra.mrb[68].mxu0 %v3463_v8  ;;  %1799 = vmatprep.mubr.bf16.mxu1 %v3464_v9 }
  0xd7   : > { %2152 = vmatprep.mubr.bf16.mxu0 %v3466_v10  ;;  %v645_v10 = vpop.permute.xlu1 %644 }
  0xdd   : > { %1800 = vmatmul.mubr.bf16.gmra.mrb[72].mxu1 %v3468_v11 }
  0xde   : > { %2153 = vmatmul.mubr.bf16.gmra.mrb[72].mxu0 %v3469_v12  ;;  %1809 = vmatprep.mubr.bf16.mxu1 %v3470_v13 }
  0xdf   : > { %2162 = vmatprep.mubr.bf16.mxu0 %v3472_v14 }
  0xe5   : > { %1810 = vmatmul.mubr.bf16.gmra.mrb[76].mxu1 %v3474_v15  ;;  %v3528_v15 = vld [vmem:[%s3984_s5 + $0x380] ss:$16 sps:$4 sm:$0xff]  }
  0xe6   : > { %2163 = vmatmul.mubr.bf16.gmra.mrb[76].mxu0 %v3475_v16  ;;  %1819 = vmatprep.mubr.bf16.mxu1 %v3476_v17 }
  0xe7   : > { %2172 = vmatprep.mubr.bf16.mxu0 %v3478_v18 }
  0xed   : > { %1820 = vmatmul.mubr.bf16.gmra.mrb[80].mxu1 %v3480_v19  ;;  %v3529_v19 = vld [vmem:[%s3984_s5 + $0x388] ss:$16 sps:$4 sm:$0xff]  }
  0xee   : > { %2173 = vmatmul.mubr.bf16.gmra.mrb[80].mxu0 %v3481_v20  ;;  %1829 = vmatprep.mubr.bf16.mxu1 %v3482_v21  ;;  %v3530_v20 = vld [vmem:[%s3984_s5 + $0x3a4] ss:$16 sps:$4 sm:$0xff]  }
  0xef   : > { %2182 = vmatprep.mubr.bf16.mxu0 %v3484_v22 }
  0xf5   : > { %1830 = vmatmul.mubr.bf16.gmra.mrb[84].mxu1 %v3486_v23 }
  0xf6   : > { %2183 = vmatmul.mubr.bf16.gmra.mrb[84].mxu0 %v3487_v24  ;;  %1839 = vmatprep.mubr.bf16.mxu1 %v3488_v25  ;;  %v3532_v25 = vld [vmem:[%s3984_s5 + $0x3ac] ss:$16 sps:$4 sm:$0xff]  }
  0xf7   : > { %2192 = vmatprep.mubr.bf16.mxu0 %v3490_v26 }
  0xfd   : > { %1840 = vmatmul.mubr.bf16.gmra.mrb[88].mxu1 %v3492_v27 }
  0xfe   : > { %2193 = vmatmul.mubr.bf16.gmra.mrb[88].mxu0 %v3493_v28  ;;  %1849 = vmatprep.mubr.bf16.mxu1 %v3494_v29 }
  0xff   : > { %2202 = vmatprep.mubr.bf16.mxu0 %v3496_v30 }
 0x105   : > { %1850 = vmatmul.mubr.bf16.gmra.mrb[92].mxu1 %v3498_v31 }
 0x106   : > { %2203 = vmatmul.mubr.bf16.gmra.mrb[92].mxu0 %v3499_v32  ;;  %1859 = vmatprep.mubr.bf16.mxu1 %v3500_v33 }
 0x107   : > { %2212 = vmatprep.mubr.bf16.mxu0 %v3502_v34  ;;  %v650_v34 = vpop.permute.xlu0 %649 }
 0x10d   : > { %1860 = vmatmul.mubr.bf16.gmra.mrb[96].mxu1 %v3504_v35  ;;  %v655_v35 = vpop.permute.xlu1 %654 }
 0x10e   : > { %2213 = vmatmul.mubr.bf16.gmra.mrb[96].mxu0 %v3505_v36  ;;  %1869 = vmatprep.mubr.bf16.mxu1 %v3506_v37 }
 0x10f   : > { %2222 = vmatprep.mubr.bf16.mxu0 %v3508_v38 }
 0x115   : > { %1870 = vmatmul.mubr.bf16.gmra.mrb[100].mxu1 %v3510_v39 }
 0x116   : > { %2223 = vmatmul.mubr.bf16.gmra.mrb[100].mxu0 %v3511_v40  ;;  %1879 = vmatprep.mubr.bf16.mxu1 %v3512_v41  ;;  %v3534_v41 = vld [vmem:[%s3984_s5 + $0x3a0] ss:$16 sps:$4 sm:$0xff]  }
 0x117   : > { %2232 = vmatprep.mubr.bf16.mxu0 %v3514_v42 }
 0x11d   : > { %1880 = vmatmul.mubr.bf16.gmra.mrb[104].mxu1 %v3516_v43 }
 0x11e   : > { %2233 = vmatmul.mubr.bf16.gmra.mrb[104].mxu0 %v3517_v44  ;;  %1889 = vmatprep.mubr.bf16.mxu1 %v3518_v46  ;;  %v3536_v46 = vld [vmem:[%s3984_s5 + $0x3c4] ss:$16 sps:$4 sm:$0xff]  }
 0x11f   : > { %2242 = vmatprep.mubr.bf16.mxu0 %v3520_v47 }
 0x120   : > { %v1621_v49 = vpop.f32.mrb[0].mxu1 }
 0x121   : > { %v1622_v51 = vadd.f32 %v1621_v49, %v630_v45  ;;  %v1974_v52 = vpop.f32.mrb[0].mxu0  ;;  %v1623_v53 = vpop.f32.mrb[1].mxu1 }
 0x122   : > { %v1624_v55 = vadd.f32 %v1623_v53, %v630_v45  ;;  %v1976_v56 = vpop.f32.mrb[1].mxu0  ;;  %v1625_v57 = vpop.f32.mrb[2].mxu1  ;;  %v3535_v45 = vld [vmem:[%s3984_s5 + $0x3a8] ss:$16 sps:$4 sm:$0xff]  }
 0x123   : > { %v1975_v60 = vadd.f32 %v1974_v52, %v1622_v51  ;;  %v1626_v61 = vadd.f32 %v1625_v57, %v635_v50  ;;  %v1978_v62 = vpop.f32.mrb[2].mxu0  ;;  %v1627_v63 = vpop.f32.mrb[3].mxu1  ;;  %v3538_v51 = vld [vmem:[%s3984_s5 + $0x3cc] ss:$16 sps:$4 sm:$0xff]  }
 0x124   : > { %v1977_v1 = vadd.f32 %v1976_v56, %v1624_v55  ;;  %v1628_v2 = vadd.f32 %v1627_v63, %v635_v50  ;;  %v1980_v3 = vpop.f32.mrb[3].mxu0 }
 0x125   : > { %v2293_v4 = vmax.f32 %v1975_v60, 0.0  ;;  %v1979_v5 = vadd.f32 %v1978_v62, %v1626_v61  ;;  %1890 = vmatmul.mubr.bf16.gmra.mrb[108].mxu1 %v3522_v54  ;;  %v665_v61 = vpop.permute.xlu1 %664 }
 0x126   : > { %v2294_v6 = vmax.f32 %v1977_v1, 0.0  ;;  %v1981_v7 = vadd.f32 %v1980_v3, %v1628_v2  ;;  %2243 = vmatmul.mubr.bf16.gmra.mrb[108].mxu0 %v3523_v58  ;;  %1899 = vmatprep.mubr.bf16.mxu1 %v3524_v59  ;;  %v660_v59 = vpop.permute.xlu0 %659  ;;  %v3540_v3 = vld [vmem:[%s3984_s5 + $0x3c0] ss:$16 sps:$4 sm:$0xff]  }
 0x127   : > { %2421 = vst [vmem:[%s4270_s12] sm:$0xff] %v2293_v4  ;;  %v2295_v8 = vmax.f32 %v1979_v5, 0.0  ;;  %2252 = vmatprep.mubr.bf16.mxu0 %v3526_v0 }
 0x128   : > { %2423 = vst.msk [vmem:[%s4270_s12 + $0x8] sm:$0xff] %vm2422_vm0, %v2294_v6  ;;  %v2296_v9 = vmax.f32 %v1981_v7, 0.0  ;;  %v1631_v11 = vpop.f32.mrb[4].mxu1  ;;  %v3541_v7 = vld [vmem:[%s3984_s5 + $0x3c8] ss:$16 sps:$4 sm:$0xff]  }
 0x129   : > { %2424 = vst [vmem:[%s4270_s12 + $0x10] sm:$0xff] %v2295_v8  ;;  %v1632_v12 = vadd.f32 %v1631_v11, %v640_v48  ;;  %v1984_v13 = vpop.f32.mrb[4].mxu0  ;;  %v1633_v14 = vpop.f32.mrb[5].mxu1  ;;  %v3542_v8 = vld [vmem:[%s3984_s5 + $0x3e4] ss:$16 sps:$4 sm:$0xff]  }
 0x12a   : > { %2425 = vst.msk [vmem:[%s4270_s12 + $0x18] sm:$0xff] %vm2422_vm0, %v2296_v9  ;;  %v1634_v16 = vadd.f32 %v1633_v14, %v640_v48  ;;  %v1986_v17 = vpop.f32.mrb[5].mxu0  ;;  %v1635_v18 = vpop.f32.mrb[6].mxu1 }
 0x12b   : > { %v1985_v21 = vadd.f32 %v1984_v13, %v1632_v12  ;;  %v1636_v22 = vadd.f32 %v1635_v18, %v645_v10  ;;  %v1988_v23 = vpop.f32.mrb[6].mxu0  ;;  %v1637_v24 = vpop.f32.mrb[7].mxu1  ;;  %v3544_v13 = vld [vmem:[%s3984_s5 + $0x3ec] ss:$16 sps:$4 sm:$0xff]  }
 0x12c   : > { %v1987_v26 = vadd.f32 %v1986_v17, %v1634_v16  ;;  %v1638_v27 = vadd.f32 %v1637_v24, %v645_v10  ;;  %v1990_v28 = vpop.f32.mrb[7].mxu0 }
 0x12d   : > { %v2297_v29 = vmax.f32 %v1985_v21, 0.0  ;;  %v1989_v30 = vadd.f32 %v1988_v23, %v1636_v22  ;;  %1900 = vmatmul.mubr.bf16.gmra.mrb[112].mxu1 %v3528_v15  ;;  %v670_v21 = vpop.permute.xlu0 %669  ;;  %v675_v23 = vpop.permute.xlu1 %674 }
 0x12e   : > { %v2298_v31 = vmax.f32 %v1987_v26, 0.0  ;;  %v1991_v32 = vadd.f32 %v1990_v28, %v1638_v27  ;;  %2253 = vmatmul.mubr.bf16.gmra.mrb[112].mxu0 %v3529_v19  ;;  %1909 = vmatprep.mubr.bf16.mxu1 %v3530_v20 }
 0x12f   : > { %2426 = vst [vmem:[%s4270_s12 + $0x20] sm:$0xff] %v2297_v29  ;;  %v2299_v33 = vmax.f32 %v1989_v30, 0.0  ;;  %2262 = vmatprep.mubr.bf16.mxu0 %v3532_v25  ;;  %v3546_v29 = vld [vmem:[%s3984_s5 + $0x3e0] ss:$16 sps:$4 sm:$0xff]  }
 0x130   : > { %2427 = vst.msk [vmem:[%s4270_s12 + $0x28] sm:$0xff] %vm2422_vm0, %v2298_v31  ;;  %v2300_v36 = vmax.f32 %v1991_v32, 0.0  ;;  %v1641_v37 = vpop.f32.mrb[8].mxu1 }
 0x131   : > { %2428 = vst [vmem:[%s4270_s12 + $0x30] sm:$0xff] %v2299_v33  ;;  %v1642_v38 = vadd.f32 %v1641_v37, %v650_v34  ;;  %v1994_v39 = vpop.f32.mrb[8].mxu0  ;;  %v1643_v40 = vpop.f32.mrb[9].mxu1  ;;  %v3547_v33 = vld [vmem:[%s3984_s5 + $0x3e8] ss:$16 sps:$4 sm:$0xff]   ;;  %s2558_s5 = ssub.s32 (%p3682_p4), 125, %s3885_s27 }
 0x132   : > { %2429 = vst.msk [vmem:[%s4270_s12 + $0x38] sm:$0xff] %vm2422_vm0, %v2300_v36  ;;  %v1644_v42 = vadd.f32 %v1643_v40, %v650_v34  ;;  %v1996_v43 = vpop.f32.mrb[9].mxu0  ;;  %v1645_v44 = vpop.f32.mrb[10].mxu1  ;;  %p2559_p8 = scmp.lt.s32.totalorder (%p3682_p4), %s2558_s5, 64 }
 0x133   : > { %v1995_v47 = vadd.f32 %v1994_v39, %v1642_v38  ;;  %v1646_v48 = vadd.f32 %v1645_v44, %v655_v35  ;;  %v1998_v49 = vpop.f32.mrb[10].mxu0  ;;  %v1647_v50 = vpop.f32.mrb[11].mxu1 }
 0x134   : > { %v1997_v52 = vadd.f32 %v1996_v43, %v1644_v42  ;;  %v1648_v53 = vadd.f32 %v1647_v50, %v655_v35  ;;  %v2000_v54 = vpop.f32.mrb[11].mxu0 }
 0x135   : > { %v2301_v55 = vmax.f32 %v1995_v47, 0.0  ;;  %v1999_v56 = vadd.f32 %v1998_v49, %v1646_v48  ;;  %1910 = vmatmul.mubr.bf16.gmra.mrb[116].mxu1 %v3534_v41  ;;  %v685_v47 = vpop.permute.xlu1 %684 }
 0x136   : > { %v2302_v57 = vmax.f32 %v1997_v52, 0.0  ;;  %v2001_v58 = vadd.f32 %v2000_v54, %v1648_v53  ;;  %2263 = vmatmul.mubr.bf16.gmra.mrb[116].mxu0 %v3535_v45  ;;  %1919 = vmatprep.mubr.bf16.mxu1 %v3536_v46  ;;  %v680_v45 = vpop.permute.xlu0 %679 }
 0x137   : > { %2430 = vst [vmem:[%s4270_s12 + $0x40] sm:$0xff] %v2301_v55  ;;  %v2303_v60 = vmax.f32 %v1999_v56, 0.0  ;;  %2272 = vmatprep.mubr.bf16.mxu0 %v3538_v51 }
 0x138   : > { %2431 = vst.msk [vmem:[%s4270_s12 + $0x48] sm:$0xff] %vm2422_vm0, %v2302_v57  ;;  %v2304_v62 = vmax.f32 %v2001_v58, 0.0  ;;  %v1651_v63 = vpop.f32.mrb[12].mxu1 }
 0x139   : > { %2432 = vst [vmem:[%s4270_s12 + $0x50] sm:$0xff] %v2303_v60  ;;  %v1652_v0 = vadd.f32 %v1651_v63, %v660_v59  ;;  %v2004_v1 = vpop.f32.mrb[12].mxu0  ;;  %v1653_v2 = vpop.f32.mrb[13].mxu1 }
 0x13a   : > { %2433 = vst.msk [vmem:[%s4270_s12 + $0x58] sm:$0xff] %vm2422_vm0, %v2304_v62  ;;  %v1654_v4 = vadd.f32 %v1653_v2, %v660_v59  ;;  %v2006_v5 = vpop.f32.mrb[13].mxu0  ;;  %v1655_v6 = vpop.f32.mrb[14].mxu1 }
 0x13b   : > { %v2005_v9 = vadd.f32 %v2004_v1, %v1652_v0  ;;  %v1656_v10 = vadd.f32 %v1655_v6, %v665_v61  ;;  %v2008_v11 = vpop.f32.mrb[14].mxu0  ;;  %v1657_v12 = vpop.f32.mrb[15].mxu1 }
 0x13c   : > { %v2007_v14 = vadd.f32 %v2006_v5, %v1654_v4  ;;  %v1658_v15 = vadd.f32 %v1657_v12, %v665_v61  ;;  %v2010_v16 = vpop.f32.mrb[15].mxu0  ;;  %v695_v5 = vpop.permute.xlu1 %694 }
 0x13d   : > { %v2305_v17 = vmax.f32 %v2005_v9, 0.0  ;;  %v2009_v18 = vadd.f32 %v2008_v11, %v1656_v10  ;;  %1920 = vmatmul.mubr.bf16.gmra.mrb[120].mxu1 %v3540_v3  ;;  %v690_v3 = vpop.permute.xlu0 %689 }
 0x13e   : > { %v2306_v19 = vmax.f32 %v2007_v14, 0.0  ;;  %v2011_v20 = vadd.f32 %v2010_v16, %v1658_v15  ;;  %2273 = vmatmul.mubr.bf16.gmra.mrb[120].mxu0 %v3541_v7  ;;  %1929 = vmatprep.mubr.bf16.mxu1 %v3542_v8 }
 0x13f   : > { %2434 = vst [vmem:[%s4270_s12 + $0x60] sm:$0xff] %v2305_v17  ;;  %v2307_v22 = vmax.f32 %v2009_v18, 0.0  ;;  %2282 = vmatprep.mubr.bf16.mxu0 %v3544_v13 }
 0x140   : > { %2435 = vst.msk [vmem:[%s4270_s12 + $0x68] sm:$0xff] %vm2422_vm0, %v2306_v19  ;;  %v2308_v24 = vmax.f32 %v2011_v20, 0.0  ;;  %v1661_v25 = vpop.f32.mrb[16].mxu1 }
 0x141   : > { %2436 = vst [vmem:[%s4270_s12 + $0x70] sm:$0xff] %v2307_v22  ;;  %v1662_v26 = vadd.f32 %v1661_v25, %v670_v21  ;;  %v2014_v27 = vpop.f32.mrb[16].mxu0  ;;  %v1663_v28 = vpop.f32.mrb[17].mxu1 }
 0x142   : > { %2437 = vst.msk [vmem:[%s4270_s12 + $0x78] sm:$0xff] %vm2422_vm0, %v2308_v24  ;;  %v1664_v30 = vadd.f32 %v1663_v28, %v670_v21  ;;  %v2016_v31 = vpop.f32.mrb[17].mxu0  ;;  %v1665_v32 = vpop.f32.mrb[18].mxu1 }
 0x143   : > { %v2015_v34 = vadd.f32 %v2014_v27, %v1662_v26  ;;  %v1666_v35 = vadd.f32 %v1665_v32, %v675_v23  ;;  %v2018_v36 = vpop.f32.mrb[18].mxu0  ;;  %v1667_v37 = vpop.f32.mrb[19].mxu1 }
 0x144   : > { %v2017_v38 = vadd.f32 %v2016_v31, %v1664_v30  ;;  %v1668_v39 = vadd.f32 %v1667_v37, %v675_v23  ;;  %v2020_v40 = vpop.f32.mrb[19].mxu0  ;;  %v700_v25 = vpop.permute.xlu0 %699 }
 0x145   : > { %v2309_v41 = vmax.f32 %v2015_v34, 0.0  ;;  %v2019_v42 = vadd.f32 %v2018_v36, %v1666_v35  ;;  %1930 = vmatmul.mubr.bf16.gmra.mrb[124].mxu1 %v3546_v29  ;;  %v705_v27 = vpop.permute.xlu1 %704 }
 0x146   : > { %v2310_v43 = vmax.f32 %v2017_v38, 0.0  ;;  %v2021_v44 = vadd.f32 %v2020_v40, %v1668_v39  ;;  %2283 = vmatmul.mubr.bf16.gmra.mrb[124].mxu0 %v3547_v33 }
 0x147   : > { %2438 = vst [vmem:[%s4270_s12 + $0x80] sm:$0xff] %v2309_v41  ;;  %v2311_v46 = vmax.f32 %v2019_v42, 0.0 }
 0x148   : > { %2439 = vst.msk [vmem:[%s4270_s12 + $0x88] sm:$0xff] %vm2422_vm0, %v2310_v43  ;;  %v2312_v48 = vmax.f32 %v2021_v44, 0.0  ;;  %v1671_v49 = vpop.f32.mrb[20].mxu1 }
 0x149   : > { %2440 = vst [vmem:[%s4270_s12 + $0x90] sm:$0xff] %v2311_v46  ;;  %v1672_v50 = vadd.f32 %v1671_v49, %v680_v45  ;;  %v2024_v51 = vpop.f32.mrb[20].mxu0  ;;  %v1673_v52 = vpop.f32.mrb[21].mxu1 }
 0x14a   : > { %2441 = vst.msk [vmem:[%s4270_s12 + $0x98] sm:$0xff] %vm2422_vm0, %v2312_v48  ;;  %v1674_v53 = vadd.f32 %v1673_v52, %v680_v45  ;;  %v2026_v54 = vpop.f32.mrb[21].mxu0  ;;  %v1675_v55 = vpop.f32.mrb[22].mxu1 }
 0x14b   : > { %v2025_v56 = vadd.f32 %v2024_v51, %v1672_v50  ;;  %v1676_v57 = vadd.f32 %v1675_v55, %v685_v47  ;;  %v2028_v58 = vpop.f32.mrb[22].mxu0  ;;  %v1677_v59 = vpop.f32.mrb[23].mxu1 }
 0x14c   : > { %v2027_v60 = vadd.f32 %v2026_v54, %v1674_v53  ;;  %v1678_v61 = vadd.f32 %v1677_v59, %v685_v47  ;;  %v2030_v62 = vpop.f32.mrb[23].mxu0  ;;  %v710_v47 = vpop.permute.xlu0 %709 }
 0x14d   : > { %v2313_v63 = vmax.f32 %v2025_v56, 0.0  ;;  %v2029_v0 = vadd.f32 %v2028_v58, %v1676_v57  ;;  %v715_v49 = vpop.permute.xlu1 %714 }
 0x14e   : > { %v2314_v1 = vmax.f32 %v2027_v60, 0.0  ;;  %v2031_v2 = vadd.f32 %v2030_v62, %v1678_v61 }
 0x14f   : > { %2442 = vst [vmem:[%s4270_s12 + $0xa0] sm:$0xff] %v2313_v63  ;;  %v2315_v4 = vmax.f32 %v2029_v0, 0.0 }
 0x150   : > { %2443 = vst.msk [vmem:[%s4270_s12 + $0xa8] sm:$0xff] %vm2422_vm0, %v2314_v1  ;;  %v2316_v6 = vmax.f32 %v2031_v2, 0.0  ;;  %v1681_v7 = vpop.f32.mrb[24].mxu1 }
 0x151   : > { %2444 = vst [vmem:[%s4270_s12 + $0xb0] sm:$0xff] %v2315_v4  ;;  %v1682_v8 = vadd.f32 %v1681_v7, %v690_v3  ;;  %v2034_v9 = vpop.f32.mrb[24].mxu0  ;;  %v1683_v10 = vpop.f32.mrb[25].mxu1 }
 0x152   : > { %2445 = vst.msk [vmem:[%s4270_s12 + $0xb8] sm:$0xff] %vm2422_vm0, %v2316_v6  ;;  %v1684_v11 = vadd.f32 %v1683_v10, %v690_v3  ;;  %v2036_v12 = vpop.f32.mrb[25].mxu0  ;;  %v1685_v13 = vpop.f32.mrb[26].mxu1 }
 0x153   : > { %v2035_v14 = vadd.f32 %v2034_v9, %v1682_v8  ;;  %v1686_v15 = vadd.f32 %v1685_v13, %v695_v5  ;;  %v2038_v16 = vpop.f32.mrb[26].mxu0  ;;  %v1687_v17 = vpop.f32.mrb[27].mxu1 }
 0x154   : > { %v2037_v18 = vadd.f32 %v2036_v12, %v1684_v11  ;;  %v1688_v19 = vadd.f32 %v1687_v17, %v695_v5  ;;  %v2040_v20 = vpop.f32.mrb[27].mxu0  ;;  %v720_v5 = vpop.permute.xlu0 %719 }
 0x155   : > { %v2317_v21 = vmax.f32 %v2035_v14, 0.0  ;;  %v2039_v22 = vadd.f32 %v2038_v16, %v1686_v15  ;;  %v725_v7 = vpop.permute.xlu1 %724 }
 0x156   : > { %v2318_v23 = vmax.f32 %v2037_v18, 0.0  ;;  %v2041_v24 = vadd.f32 %v2040_v20, %v1688_v19 }
 0x157   : > { %2446 = vst [vmem:[%s4270_s12 + $0xc0] sm:$0xff] %v2317_v21  ;;  %v2319_v26 = vmax.f32 %v2039_v22, 0.0 }
 0x158   : > { %2447 = vst.msk [vmem:[%s4270_s12 + $0xc8] sm:$0xff] %vm2422_vm0, %v2318_v23  ;;  %v2320_v28 = vmax.f32 %v2041_v24, 0.0  ;;  %v1691_v29 = vpop.f32.mrb[28].mxu1 }
 0x159   : > { %2448 = vst [vmem:[%s4270_s12 + $0xd0] sm:$0xff] %v2319_v26  ;;  %v1692_v30 = vadd.f32 %v1691_v29, %v700_v25  ;;  %v2044_v31 = vpop.f32.mrb[28].mxu0  ;;  %v1693_v32 = vpop.f32.mrb[29].mxu1 }
 0x15a   : > { %2449 = vst.msk [vmem:[%s4270_s12 + $0xd8] sm:$0xff] %vm2422_vm0, %v2320_v28  ;;  %v1694_v33 = vadd.f32 %v1693_v32, %v700_v25  ;;  %v2046_v34 = vpop.f32.mrb[29].mxu0  ;;  %v1695_v35 = vpop.f32.mrb[30].mxu1 }
 0x15b   : > { %v2045_v36 = vadd.f32 %v2044_v31, %v1692_v30  ;;  %v1696_v37 = vadd.f32 %v1695_v35, %v705_v27  ;;  %v2048_v38 = vpop.f32.mrb[30].mxu0  ;;  %v1697_v39 = vpop.f32.mrb[31].mxu1 }
 0x15c   : > { %v2047_v40 = vadd.f32 %v2046_v34, %v1694_v33  ;;  %v1698_v41 = vadd.f32 %v1697_v39, %v705_v27  ;;  %v2050_v42 = vpop.f32.mrb[31].mxu0  ;;  %v730_v27 = vpop.permute.xlu0 %729 }
 0x15d   : > { %v2321_v43 = vmax.f32 %v2045_v36, 0.0  ;;  %v2049_v44 = vadd.f32 %v2048_v38, %v1696_v37  ;;  %v735_v29 = vpop.permute.xlu1 %734 }
 0x15e   : > { %v2322_v45 = vmax.f32 %v2047_v40, 0.0  ;;  %v2051_v46 = vadd.f32 %v2050_v42, %v1698_v41 }
 0x15f   : > { %2450 = vst [vmem:[%s4270_s12 + $0xe0] sm:$0xff] %v2321_v43  ;;  %v2323_v48 = vmax.f32 %v2049_v44, 0.0 }
 0x160   : > { %2451 = vst.msk [vmem:[%s4270_s12 + $0xe8] sm:$0xff] %vm2422_vm0, %v2322_v45  ;;  %v2324_v50 = vmax.f32 %v2051_v46, 0.0  ;;  %v1701_v51 = vpop.f32.mrb[32].mxu1 }
 0x161   : > { %2452 = vst [vmem:[%s4270_s12 + $0xf0] sm:$0xff] %v2323_v48  ;;  %v1702_v52 = vadd.f32 %v1701_v51, %v710_v47  ;;  %v2054_v53 = vpop.f32.mrb[32].mxu0  ;;  %v1703_v54 = vpop.f32.mrb[33].mxu1 }
 0x162   : > { %2453 = vst.msk [vmem:[%s4270_s12 + $0xf8] sm:$0xff] %vm2422_vm0, %v2324_v50  ;;  %v1704_v55 = vadd.f32 %v1703_v54, %v710_v47  ;;  %v2056_v56 = vpop.f32.mrb[33].mxu0  ;;  %v1705_v57 = vpop.f32.mrb[34].mxu1 }
 0x163   : > { %v2055_v58 = vadd.f32 %v2054_v53, %v1702_v52  ;;  %v1706_v59 = vadd.f32 %v1705_v57, %v715_v49  ;;  %v2058_v60 = vpop.f32.mrb[34].mxu0  ;;  %v1707_v61 = vpop.f32.mrb[35].mxu1 }
 0x164   : > { %v2057_v62 = vadd.f32 %v2056_v56, %v1704_v55  ;;  %v1708_v63 = vadd.f32 %v1707_v61, %v715_v49  ;;  %v2060_v0 = vpop.f32.mrb[35].mxu0  ;;  %v740_v49 = vpop.permute.xlu0 %739 }
 0x165   : > { %v2325_v1 = vmax.f32 %v2055_v58, 0.0  ;;  %v2059_v2 = vadd.f32 %v2058_v60, %v1706_v59  ;;  %v745_v51 = vpop.permute.xlu1 %744 }
 0x166   : > { %v2326_v3 = vmax.f32 %v2057_v62, 0.0  ;;  %v2061_v4 = vadd.f32 %v2060_v0, %v1708_v63 }
 0x167   : > { %2454 = vst [vmem:[%s4270_s12 + $0x100] sm:$0xff] %v2325_v1  ;;  %v2327_v6 = vmax.f32 %v2059_v2, 0.0 }
 0x168   : > { %2455 = vst.msk [vmem:[%s4270_s12 + $0x108] sm:$0xff] %vm2422_vm0, %v2326_v3  ;;  %v2328_v8 = vmax.f32 %v2061_v4, 0.0  ;;  %v1711_v9 = vpop.f32.mrb[36].mxu1 }
 0x169   : > { %2456 = vst [vmem:[%s4270_s12 + $0x110] sm:$0xff] %v2327_v6  ;;  %v1712_v10 = vadd.f32 %v1711_v9, %v720_v5  ;;  %v2064_v11 = vpop.f32.mrb[36].mxu0  ;;  %v1713_v12 = vpop.f32.mrb[37].mxu1 }
 0x16a   : > { %2457 = vst.msk [vmem:[%s4270_s12 + $0x118] sm:$0xff] %vm2422_vm0, %v2328_v8  ;;  %v1714_v13 = vadd.f32 %v1713_v12, %v720_v5  ;;  %v2066_v14 = vpop.f32.mrb[37].mxu0  ;;  %v1715_v15 = vpop.f32.mrb[38].mxu1 }
 0x16b   : > { %v2065_v16 = vadd.f32 %v2064_v11, %v1712_v10  ;;  %v1716_v17 = vadd.f32 %v1715_v15, %v725_v7  ;;  %v2068_v18 = vpop.f32.mrb[38].mxu0  ;;  %v1717_v19 = vpop.f32.mrb[39].mxu1 }
 0x16c   : > { %v2067_v20 = vadd.f32 %v2066_v14, %v1714_v13  ;;  %v1718_v21 = vadd.f32 %v1717_v19, %v725_v7  ;;  %v2070_v22 = vpop.f32.mrb[39].mxu0  ;;  %v750_v7 = vpop.permute.xlu0 %749 }
 0x16d   : > { %v2329_v23 = vmax.f32 %v2065_v16, 0.0  ;;  %v2069_v24 = vadd.f32 %v2068_v18, %v1716_v17  ;;  %v755_v9 = vpop.permute.xlu1 %754 }
 0x16e   : > { %v2330_v25 = vmax.f32 %v2067_v20, 0.0  ;;  %v2071_v26 = vadd.f32 %v2070_v22, %v1718_v21 }
 0x16f   : > { %2458 = vst [vmem:[%s4270_s12 + $0x120] sm:$0xff] %v2329_v23  ;;  %v2331_v28 = vmax.f32 %v2069_v24, 0.0 }
 0x170   : > { %2459 = vst.msk [vmem:[%s4270_s12 + $0x128] sm:$0xff] %vm2422_vm0, %v2330_v25  ;;  %v2332_v30 = vmax.f32 %v2071_v26, 0.0  ;;  %v1721_v31 = vpop.f32.mrb[40].mxu1 }
 0x171   : > { %2460 = vst [vmem:[%s4270_s12 + $0x130] sm:$0xff] %v2331_v28  ;;  %v1722_v32 = vadd.f32 %v1721_v31, %v730_v27  ;;  %v2074_v33 = vpop.f32.mrb[40].mxu0  ;;  %v1723_v34 = vpop.f32.mrb[41].mxu1 }
 0x172   : > { %2461 = vst.msk [vmem:[%s4270_s12 + $0x138] sm:$0xff] %vm2422_vm0, %v2332_v30  ;;  %v1724_v35 = vadd.f32 %v1723_v34, %v730_v27  ;;  %v2076_v36 = vpop.f32.mrb[41].mxu0  ;;  %v1725_v37 = vpop.f32.mrb[42].mxu1 }
 0x173   : > { %v2075_v38 = vadd.f32 %v2074_v33, %v1722_v32  ;;  %v1726_v39 = vadd.f32 %v1725_v37, %v735_v29  ;;  %v2078_v40 = vpop.f32.mrb[42].mxu0  ;;  %v1727_v41 = vpop.f32.mrb[43].mxu1 }
 0x174   : > { %v2077_v42 = vadd.f32 %v2076_v36, %v1724_v35  ;;  %v1728_v43 = vadd.f32 %v1727_v41, %v735_v29  ;;  %v2080_v44 = vpop.f32.mrb[43].mxu0  ;;  %v760_v29 = vpop.permute.xlu0 %759 }
 0x175   : > { %v2333_v45 = vmax.f32 %v2075_v38, 0.0  ;;  %v2079_v46 = vadd.f32 %v2078_v40, %v1726_v39  ;;  %v765_v31 = vpop.permute.xlu1 %764 }
 0x176   : > { %v2334_v47 = vmax.f32 %v2077_v42, 0.0  ;;  %v2081_v48 = vadd.f32 %v2080_v44, %v1728_v43 }
 0x177   : > { %2462 = vst [vmem:[%s4270_s12 + $0x140] sm:$0xff] %v2333_v45  ;;  %v2335_v50 = vmax.f32 %v2079_v46, 0.0 }
 0x178   : > { %2463 = vst.msk [vmem:[%s4270_s12 + $0x148] sm:$0xff] %vm2422_vm0, %v2334_v47  ;;  %v2336_v52 = vmax.f32 %v2081_v48, 0.0  ;;  %v1731_v53 = vpop.f32.mrb[44].mxu1 }
 0x179   : > { %2464 = vst [vmem:[%s4270_s12 + $0x150] sm:$0xff] %v2335_v50  ;;  %v1732_v54 = vadd.f32 %v1731_v53, %v740_v49  ;;  %v2084_v55 = vpop.f32.mrb[44].mxu0  ;;  %v1733_v56 = vpop.f32.mrb[45].mxu1 }
 0x17a   : > { %2465 = vst.msk [vmem:[%s4270_s12 + $0x158] sm:$0xff] %vm2422_vm0, %v2336_v52  ;;  %v1734_v57 = vadd.f32 %v1733_v56, %v740_v49  ;;  %v2086_v58 = vpop.f32.mrb[45].mxu0  ;;  %v1735_v59 = vpop.f32.mrb[46].mxu1 }
 0x17b   : > { %v2085_v60 = vadd.f32 %v2084_v55, %v1732_v54  ;;  %v1736_v61 = vadd.f32 %v1735_v59, %v745_v51  ;;  %v2088_v62 = vpop.f32.mrb[46].mxu0  ;;  %v1737_v63 = vpop.f32.mrb[47].mxu1 }
 0x17c   : > { %v2087_v0 = vadd.f32 %v2086_v58, %v1734_v57  ;;  %v1738_v1 = vadd.f32 %v1737_v63, %v745_v51  ;;  %v2090_v2 = vpop.f32.mrb[47].mxu0  ;;  %v770_v51 = vpop.permute.xlu0 %769 }
 0x17d   : > { %v2337_v3 = vmax.f32 %v2085_v60, 0.0  ;;  %v2089_v4 = vadd.f32 %v2088_v62, %v1736_v61  ;;  %v775_v53 = vpop.permute.xlu1 %774 }
 0x17e   : > { %v2338_v5 = vmax.f32 %v2087_v0, 0.0  ;;  %v2091_v6 = vadd.f32 %v2090_v2, %v1738_v1 }
 0x17f   : > { %2466 = vst [vmem:[%s4270_s12 + $0x160] sm:$0xff] %v2337_v3  ;;  %v2339_v8 = vmax.f32 %v2089_v4, 0.0 }
 0x180   : > { %2467 = vst.msk [vmem:[%s4270_s12 + $0x168] sm:$0xff] %vm2422_vm0, %v2338_v5  ;;  %v2340_v10 = vmax.f32 %v2091_v6, 0.0  ;;  %v1741_v11 = vpop.f32.mrb[48].mxu1 }
 0x181   : > { %2468 = vst [vmem:[%s4270_s12 + $0x170] sm:$0xff] %v2339_v8  ;;  %v1742_v12 = vadd.f32 %v1741_v11, %v750_v7  ;;  %v2094_v13 = vpop.f32.mrb[48].mxu0  ;;  %v1743_v14 = vpop.f32.mrb[49].mxu1 }
 0x182   : > { %2469 = vst.msk [vmem:[%s4270_s12 + $0x178] sm:$0xff] %vm2422_vm0, %v2340_v10  ;;  %v1744_v15 = vadd.f32 %v1743_v14, %v750_v7  ;;  %v2096_v16 = vpop.f32.mrb[49].mxu0  ;;  %v1745_v17 = vpop.f32.mrb[50].mxu1 }
 0x183   : > { %v2095_v18 = vadd.f32 %v2094_v13, %v1742_v12  ;;  %v1746_v19 = vadd.f32 %v1745_v17, %v755_v9  ;;  %v2098_v20 = vpop.f32.mrb[50].mxu0  ;;  %v1747_v21 = vpop.f32.mrb[51].mxu1 }
 0x184   : > { %v2097_v22 = vadd.f32 %v2096_v16, %v1744_v15  ;;  %v1748_v23 = vadd.f32 %v1747_v21, %v755_v9  ;;  %v2100_v24 = vpop.f32.mrb[51].mxu0  ;;  %v780_v9 = vpop.permute.xlu0 %779 }
 0x185   : > { %v2341_v25 = vmax.f32 %v2095_v18, 0.0  ;;  %v2099_v26 = vadd.f32 %v2098_v20, %v1746_v19  ;;  %v785_v11 = vpop.permute.xlu1 %784 }
 0x186   : > { %v2342_v27 = vmax.f32 %v2097_v22, 0.0  ;;  %v2101_v28 = vadd.f32 %v2100_v24, %v1748_v23 }
 0x187   : > { %2470 = vst [vmem:[%s4270_s12 + $0x180] sm:$0xff] %v2341_v25  ;;  %v2343_v30 = vmax.f32 %v2099_v26, 0.0 }
 0x188   : > { %2471 = vst.msk [vmem:[%s4270_s12 + $0x188] sm:$0xff] %vm2422_vm0, %v2342_v27  ;;  %v2344_v32 = vmax.f32 %v2101_v28, 0.0  ;;  %v1751_v33 = vpop.f32.mrb[52].mxu1 }
 0x189   : > { %2472 = vst [vmem:[%s4270_s12 + $0x190] sm:$0xff] %v2343_v30  ;;  %v1752_v34 = vadd.f32 %v1751_v33, %v760_v29  ;;  %v2104_v35 = vpop.f32.mrb[52].mxu0  ;;  %v1753_v36 = vpop.f32.mrb[53].mxu1 }
 0x18a   : > { %2473 = vst.msk [vmem:[%s4270_s12 + $0x198] sm:$0xff] %vm2422_vm0, %v2344_v32  ;;  %v1754_v37 = vadd.f32 %v1753_v36, %v760_v29  ;;  %v2106_v38 = vpop.f32.mrb[53].mxu0  ;;  %v1755_v39 = vpop.f32.mrb[54].mxu1 }
 0x18b   : > { %v2105_v40 = vadd.f32 %v2104_v35, %v1752_v34  ;;  %v1756_v41 = vadd.f32 %v1755_v39, %v765_v31  ;;  %v2108_v42 = vpop.f32.mrb[54].mxu0  ;;  %v1757_v43 = vpop.f32.mrb[55].mxu1 }
 0x18c   : > { %v2107_v44 = vadd.f32 %v2106_v38, %v1754_v37  ;;  %v1758_v45 = vadd.f32 %v1757_v43, %v765_v31  ;;  %v2110_v46 = vpop.f32.mrb[55].mxu0  ;;  %v790_v31 = vpop.permute.xlu0 %789 }
 0x18d   : > { %v2345_v47 = vmax.f32 %v2105_v40, 0.0  ;;  %v2109_v48 = vadd.f32 %v2108_v42, %v1756_v41  ;;  %v795_v33 = vpop.permute.xlu1 %794 }
 0x18e   : > { %v2346_v49 = vmax.f32 %v2107_v44, 0.0  ;;  %v2111_v50 = vadd.f32 %v2110_v46, %v1758_v45 }
 0x18f   : > { %2474 = vst [vmem:[%s4270_s12 + $0x1a0] sm:$0xff] %v2345_v47  ;;  %v2347_v52 = vmax.f32 %v2109_v48, 0.0 }
 0x190   : > { %2475 = vst.msk [vmem:[%s4270_s12 + $0x1a8] sm:$0xff] %vm2422_vm0, %v2346_v49  ;;  %v2348_v54 = vmax.f32 %v2111_v50, 0.0  ;;  %v1761_v55 = vpop.f32.mrb[56].mxu1 }
 0x191   : > { %2476 = vst [vmem:[%s4270_s12 + $0x1b0] sm:$0xff] %v2347_v52  ;;  %v1762_v56 = vadd.f32 %v1761_v55, %v770_v51  ;;  %v2114_v57 = vpop.f32.mrb[56].mxu0  ;;  %v1763_v58 = vpop.f32.mrb[57].mxu1 }
 0x192   : > { %2477 = vst.msk [vmem:[%s4270_s12 + $0x1b8] sm:$0xff] %vm2422_vm0, %v2348_v54  ;;  %v1764_v59 = vadd.f32 %v1763_v58, %v770_v51  ;;  %v2116_v60 = vpop.f32.mrb[57].mxu0  ;;  %v1765_v61 = vpop.f32.mrb[58].mxu1 }
 0x193   : > { %v2115_v62 = vadd.f32 %v2114_v57, %v1762_v56  ;;  %v1766_v63 = vadd.f32 %v1765_v61, %v775_v53  ;;  %v2118_v0 = vpop.f32.mrb[58].mxu0  ;;  %v1767_v1 = vpop.f32.mrb[59].mxu1 }
 0x194   : > { %v2117_v2 = vadd.f32 %v2116_v60, %v1764_v59  ;;  %v1768_v3 = vadd.f32 %v1767_v1, %v775_v53  ;;  %v2120_v4 = vpop.f32.mrb[59].mxu0  ;;  %v800_v53 = vpop.permute.xlu0 %799 }
 0x195   : > { %v2349_v5 = vmax.f32 %v2115_v62, 0.0  ;;  %v2119_v6 = vadd.f32 %v2118_v0, %v1766_v63  ;;  %v805_v55 = vpop.permute.xlu1 %804 }
 0x196   : > { %v2350_v7 = vmax.f32 %v2117_v2, 0.0  ;;  %v2121_v8 = vadd.f32 %v2120_v4, %v1768_v3 }
 0x197   : > { %2478 = vst [vmem:[%s4270_s12 + $0x1c0] sm:$0xff] %v2349_v5  ;;  %v2351_v10 = vmax.f32 %v2119_v6, 0.0 }
 0x198   : > { %2479 = vst.msk [vmem:[%s4270_s12 + $0x1c8] sm:$0xff] %vm2422_vm0, %v2350_v7  ;;  %v2352_v12 = vmax.f32 %v2121_v8, 0.0  ;;  %v1771_v13 = vpop.f32.mrb[60].mxu1 }
 0x199   : > { %2480 = vst [vmem:[%s4270_s12 + $0x1d0] sm:$0xff] %v2351_v10  ;;  %v1772_v14 = vadd.f32 %v1771_v13, %v780_v9  ;;  %v2124_v15 = vpop.f32.mrb[60].mxu0  ;;  %v1773_v16 = vpop.f32.mrb[61].mxu1 }
 0x19a   : > { %2481 = vst.msk [vmem:[%s4270_s12 + $0x1d8] sm:$0xff] %vm2422_vm0, %v2352_v12  ;;  %v1774_v17 = vadd.f32 %v1773_v16, %v780_v9  ;;  %v2126_v18 = vpop.f32.mrb[61].mxu0  ;;  %v1775_v19 = vpop.f32.mrb[62].mxu1 }
 0x19b   : > { %v2125_v20 = vadd.f32 %v2124_v15, %v1772_v14  ;;  %v1776_v21 = vadd.f32 %v1775_v19, %v785_v11  ;;  %v2128_v22 = vpop.f32.mrb[62].mxu0  ;;  %v1777_v23 = vpop.f32.mrb[63].mxu1 }
 0x19c   : > { %v2127_v24 = vadd.f32 %v2126_v18, %v1774_v17  ;;  %v1778_v25 = vadd.f32 %v1777_v23, %v785_v11  ;;  %v2130_v26 = vpop.f32.mrb[63].mxu0  ;;  %v810_v11 = vpop.permute.xlu0 %809 }
 0x19d   : > { %v2353_v27 = vmax.f32 %v2125_v20, 0.0  ;;  %v2129_v28 = vadd.f32 %v2128_v22, %v1776_v21  ;;  %v815_v13 = vpop.permute.xlu1 %814 }
 0x19e   : > { %v2354_v29 = vmax.f32 %v2127_v24, 0.0  ;;  %v2131_v30 = vadd.f32 %v2130_v26, %v1778_v25 }
 0x19f   : > { %2482 = vst [vmem:[%s4270_s12 + $0x1e0] sm:$0xff] %v2353_v27  ;;  %v2355_v32 = vmax.f32 %v2129_v28, 0.0 }
 0x1a0   : > { %2483 = vst.msk [vmem:[%s4270_s12 + $0x1e8] sm:$0xff] %vm2422_vm0, %v2354_v29  ;;  %v2356_v34 = vmax.f32 %v2131_v30, 0.0  ;;  %v1781_v35 = vpop.f32.mrb[64].mxu1 }
 0x1a1   : > { %2484 = vst [vmem:[%s4270_s12 + $0x1f0] sm:$0xff] %v2355_v32  ;;  %v1782_v36 = vadd.f32 %v1781_v35, %v790_v31  ;;  %v2134_v37 = vpop.f32.mrb[64].mxu0  ;;  %v1783_v38 = vpop.f32.mrb[65].mxu1 }
 0x1a2   : > { %2485 = vst.msk [vmem:[%s4270_s12 + $0x1f8] sm:$0xff] %vm2422_vm0, %v2356_v34  ;;  %v1784_v39 = vadd.f32 %v1783_v38, %v790_v31  ;;  %v2136_v40 = vpop.f32.mrb[65].mxu0  ;;  %v1785_v41 = vpop.f32.mrb[66].mxu1 }
 0x1a3   : > { %v2135_v42 = vadd.f32 %v2134_v37, %v1782_v36  ;;  %v1786_v43 = vadd.f32 %v1785_v41, %v795_v33  ;;  %v2138_v44 = vpop.f32.mrb[66].mxu0  ;;  %v1787_v45 = vpop.f32.mrb[67].mxu1 }
 0x1a4   : > { %v2137_v46 = vadd.f32 %v2136_v40, %v1784_v39  ;;  %v1788_v47 = vadd.f32 %v1787_v45, %v795_v33  ;;  %v2140_v48 = vpop.f32.mrb[67].mxu0  ;;  %v820_v33 = vpop.permute.xlu0 %819 }
 0x1a5   : > { %v2357_v49 = vmax.f32 %v2135_v42, 0.0  ;;  %v2139_v50 = vadd.f32 %v2138_v44, %v1786_v43  ;;  %v825_v35 = vpop.permute.xlu1 %824 }
 0x1a6   : > { %v2358_v51 = vmax.f32 %v2137_v46, 0.0  ;;  %v2141_v52 = vadd.f32 %v2140_v48, %v1788_v47 }
 0x1a7   : > { %2486 = vst [vmem:[%s4270_s12 + $0x200] sm:$0xff] %v2357_v49  ;;  %v2359_v54 = vmax.f32 %v2139_v50, 0.0 }
 0x1a8   : > { %2487 = vst.msk [vmem:[%s4270_s12 + $0x208] sm:$0xff] %vm2422_vm0, %v2358_v51  ;;  %v2360_v56 = vmax.f32 %v2141_v52, 0.0  ;;  %v1791_v57 = vpop.f32.mrb[68].mxu1 }
 0x1a9   : > { %2488 = vst [vmem:[%s4270_s12 + $0x210] sm:$0xff] %v2359_v54  ;;  %v1792_v58 = vadd.f32 %v1791_v57, %v800_v53  ;;  %v2144_v59 = vpop.f32.mrb[68].mxu0  ;;  %v1793_v60 = vpop.f32.mrb[69].mxu1 }
 0x1aa   : > { %2489 = vst.msk [vmem:[%s4270_s12 + $0x218] sm:$0xff] %vm2422_vm0, %v2360_v56  ;;  %v1794_v61 = vadd.f32 %v1793_v60, %v800_v53  ;;  %v2146_v62 = vpop.f32.mrb[69].mxu0  ;;  %v1795_v63 = vpop.f32.mrb[70].mxu1 }
 0x1ab   : > { %v2145_v0 = vadd.f32 %v2144_v59, %v1792_v58  ;;  %v1796_v1 = vadd.f32 %v1795_v63, %v805_v55  ;;  %v2148_v2 = vpop.f32.mrb[70].mxu0  ;;  %v1797_v3 = vpop.f32.mrb[71].mxu1 }
 0x1ac   : > { %v2147_v4 = vadd.f32 %v2146_v62, %v1794_v61  ;;  %v1798_v5 = vadd.f32 %v1797_v3, %v805_v55  ;;  %v2150_v6 = vpop.f32.mrb[71].mxu0  ;;  %v835_v55 = vpop.permute.xlu1 %834 }
 0x1ad   : > { %v2361_v7 = vmax.f32 %v2145_v0, 0.0  ;;  %v2149_v8 = vadd.f32 %v2148_v2, %v1796_v1  ;;  %v830_v57 = vpop.permute.xlu0 %829 }
 0x1ae   : > { %v2362_v9 = vmax.f32 %v2147_v4, 0.0  ;;  %v2151_v10 = vadd.f32 %v2150_v6, %v1798_v5 }
 0x1af   : > { %2490 = vst [vmem:[%s4270_s12 + $0x220] sm:$0xff] %v2361_v7  ;;  %v2363_v12 = vmax.f32 %v2149_v8, 0.0 }
 0x1b0   : > { %2491 = vst.msk [vmem:[%s4270_s12 + $0x228] sm:$0xff] %vm2422_vm0, %v2362_v9  ;;  %v2364_v14 = vmax.f32 %v2151_v10, 0.0  ;;  %v1801_v15 = vpop.f32.mrb[72].mxu1 }
 0x1b1   : > { %2492 = vst [vmem:[%s4270_s12 + $0x230] sm:$0xff] %v2363_v12  ;;  %v1802_v16 = vadd.f32 %v1801_v15, %v810_v11  ;;  %v2154_v17 = vpop.f32.mrb[72].mxu0  ;;  %v1803_v18 = vpop.f32.mrb[73].mxu1 }
 0x1b2   : > { %2493 = vst.msk [vmem:[%s4270_s12 + $0x238] sm:$0xff] %vm2422_vm0, %v2364_v14  ;;  %v1804_v19 = vadd.f32 %v1803_v18, %v810_v11  ;;  %v2156_v20 = vpop.f32.mrb[73].mxu0  ;;  %v1805_v21 = vpop.f32.mrb[74].mxu1 }
 0x1b3   : > { %v2155_v22 = vadd.f32 %v2154_v17, %v1802_v16  ;;  %v1806_v23 = vadd.f32 %v1805_v21, %v815_v13  ;;  %v2158_v24 = vpop.f32.mrb[74].mxu0  ;;  %v1807_v25 = vpop.f32.mrb[75].mxu1 }
 0x1b4   : > { %v2157_v26 = vadd.f32 %v2156_v20, %v1804_v19  ;;  %v1808_v27 = vadd.f32 %v1807_v25, %v815_v13  ;;  %v2160_v28 = vpop.f32.mrb[75].mxu0  ;;  %v845_v13 = vpop.permute.xlu1 %844 }
 0x1b5   : > { %v2365_v29 = vmax.f32 %v2155_v22, 0.0  ;;  %v2159_v30 = vadd.f32 %v2158_v24, %v1806_v23  ;;  %v840_v15 = vpop.permute.xlu0 %839 }
 0x1b6   : > { %v2366_v31 = vmax.f32 %v2157_v26, 0.0  ;;  %v2161_v32 = vadd.f32 %v2160_v28, %v1808_v27 }
 0x1b7   : > { %2494 = vst [vmem:[%s4270_s12 + $0x240] sm:$0xff] %v2365_v29  ;;  %v2367_v34 = vmax.f32 %v2159_v30, 0.0 }
 0x1b8   : > { %2495 = vst.msk [vmem:[%s4270_s12 + $0x248] sm:$0xff] %vm2422_vm0, %v2366_v31  ;;  %v2368_v36 = vmax.f32 %v2161_v32, 0.0  ;;  %v1811_v37 = vpop.f32.mrb[76].mxu1 }
 0x1b9   : > { %2496 = vst [vmem:[%s4270_s12 + $0x250] sm:$0xff] %v2367_v34  ;;  %v1812_v38 = vadd.f32 %v1811_v37, %v820_v33  ;;  %v2164_v39 = vpop.f32.mrb[76].mxu0  ;;  %v1813_v40 = vpop.f32.mrb[77].mxu1 }
 0x1ba   : > { %2497 = vst.msk [vmem:[%s4270_s12 + $0x258] sm:$0xff] %vm2422_vm0, %v2368_v36  ;;  %v1814_v41 = vadd.f32 %v1813_v40, %v820_v33  ;;  %v2166_v42 = vpop.f32.mrb[77].mxu0  ;;  %v1815_v43 = vpop.f32.mrb[78].mxu1 }
 0x1bb   : > { %v2165_v44 = vadd.f32 %v2164_v39, %v1812_v38  ;;  %v1816_v45 = vadd.f32 %v1815_v43, %v825_v35  ;;  %v2168_v46 = vpop.f32.mrb[78].mxu0  ;;  %v1817_v47 = vpop.f32.mrb[79].mxu1 }
 0x1bc   : > { %v2167_v48 = vadd.f32 %v2166_v42, %v1814_v41  ;;  %v1818_v49 = vadd.f32 %v1817_v47, %v825_v35  ;;  %v2170_v50 = vpop.f32.mrb[79].mxu0  ;;  %v855_v35 = vpop.permute.xlu1 %854 }
 0x1bd   : > { %v2369_v51 = vmax.f32 %v2165_v44, 0.0  ;;  %v2169_v52 = vadd.f32 %v2168_v46, %v1816_v45  ;;  %v850_v37 = vpop.permute.xlu0 %849 }
 0x1be   : > { %v2370_v53 = vmax.f32 %v2167_v48, 0.0  ;;  %v2171_v54 = vadd.f32 %v2170_v50, %v1818_v49 }
 0x1bf   : > { %2498 = vst [vmem:[%s4270_s12 + $0x260] sm:$0xff] %v2369_v51  ;;  %v2371_v56 = vmax.f32 %v2169_v52, 0.0 }
 0x1c0   : > { %2499 = vst.msk [vmem:[%s4270_s12 + $0x268] sm:$0xff] %vm2422_vm0, %v2370_v53  ;;  %v2372_v58 = vmax.f32 %v2171_v54, 0.0  ;;  %v1821_v59 = vpop.f32.mrb[80].mxu1 }
 0x1c1   : > { %2500 = vst [vmem:[%s4270_s12 + $0x270] sm:$0xff] %v2371_v56  ;;  %v1822_v60 = vadd.f32 %v1821_v59, %v830_v57  ;;  %v2174_v61 = vpop.f32.mrb[80].mxu0  ;;  %v1823_v62 = vpop.f32.mrb[81].mxu1 }
 0x1c2   : > { %2501 = vst.msk [vmem:[%s4270_s12 + $0x278] sm:$0xff] %vm2422_vm0, %v2372_v58  ;;  %v1824_v63 = vadd.f32 %v1823_v62, %v830_v57  ;;  %v2176_v0 = vpop.f32.mrb[81].mxu0  ;;  %v1825_v1 = vpop.f32.mrb[82].mxu1 }
 0x1c3   : > { %v2175_v2 = vadd.f32 %v2174_v61, %v1822_v60  ;;  %v1826_v3 = vadd.f32 %v1825_v1, %v835_v55  ;;  %v2178_v4 = vpop.f32.mrb[82].mxu0  ;;  %v1827_v5 = vpop.f32.mrb[83].mxu1 }
 0x1c4   : > { %v2177_v6 = vadd.f32 %v2176_v0, %v1824_v63  ;;  %v1828_v7 = vadd.f32 %v1827_v5, %v835_v55  ;;  %v2180_v8 = vpop.f32.mrb[83].mxu0  ;;  %v865_v57 = vpop.permute.xlu1 %864 }
 0x1c5   : > { %v2373_v9 = vmax.f32 %v2175_v2, 0.0  ;;  %v2179_v10 = vadd.f32 %v2178_v4, %v1826_v3  ;;  %v860_v59 = vpop.permute.xlu0 %859 }
 0x1c6   : > { %v2374_v11 = vmax.f32 %v2177_v6, 0.0  ;;  %v2181_v12 = vadd.f32 %v2180_v8, %v1828_v7 }
 0x1c7   : > { %2502 = vst [vmem:[%s4270_s12 + $0x280] sm:$0xff] %v2373_v9  ;;  %v2375_v14 = vmax.f32 %v2179_v10, 0.0 }
 0x1c8   : > { %2503 = vst.msk [vmem:[%s4270_s12 + $0x288] sm:$0xff] %vm2422_vm0, %v2374_v11  ;;  %v2376_v16 = vmax.f32 %v2181_v12, 0.0  ;;  %v1831_v17 = vpop.f32.mrb[84].mxu1 }
 0x1c9   : > { %2504 = vst [vmem:[%s4270_s12 + $0x290] sm:$0xff] %v2375_v14  ;;  %v1832_v18 = vadd.f32 %v1831_v17, %v840_v15  ;;  %v2184_v19 = vpop.f32.mrb[84].mxu0  ;;  %v1833_v20 = vpop.f32.mrb[85].mxu1 }
 0x1ca   : > { %2505 = vst.msk [vmem:[%s4270_s12 + $0x298] sm:$0xff] %vm2422_vm0, %v2376_v16  ;;  %v1834_v21 = vadd.f32 %v1833_v20, %v840_v15  ;;  %v2186_v22 = vpop.f32.mrb[85].mxu0  ;;  %v1835_v23 = vpop.f32.mrb[86].mxu1 }
 0x1cb   : > { %v2185_v24 = vadd.f32 %v2184_v19, %v1832_v18  ;;  %v1836_v25 = vadd.f32 %v1835_v23, %v845_v13  ;;  %v2188_v26 = vpop.f32.mrb[86].mxu0  ;;  %v1837_v27 = vpop.f32.mrb[87].mxu1 }
 0x1cc   : > { %v2187_v28 = vadd.f32 %v2186_v22, %v1834_v21  ;;  %v1838_v29 = vadd.f32 %v1837_v27, %v845_v13  ;;  %v2190_v30 = vpop.f32.mrb[87].mxu0  ;;  %v875_v15 = vpop.permute.xlu1 %874 }
 0x1cd   : > { %v2377_v31 = vmax.f32 %v2185_v24, 0.0  ;;  %v2189_v32 = vadd.f32 %v2188_v26, %v1836_v25  ;;  %v870_v17 = vpop.permute.xlu0 %869 }
 0x1ce   : > { %v2378_v33 = vmax.f32 %v2187_v28, 0.0  ;;  %v2191_v34 = vadd.f32 %v2190_v30, %v1838_v29 }
 0x1cf   : > { %2506 = vst [vmem:[%s4270_s12 + $0x2a0] sm:$0xff] %v2377_v31  ;;  %v2379_v36 = vmax.f32 %v2189_v32, 0.0 }
 0x1d0   : > { %2507 = vst.msk [vmem:[%s4270_s12 + $0x2a8] sm:$0xff] %vm2422_vm0, %v2378_v33  ;;  %v2380_v38 = vmax.f32 %v2191_v34, 0.0  ;;  %v1841_v39 = vpop.f32.mrb[88].mxu1 }
 0x1d1   : > { %2508 = vst [vmem:[%s4270_s12 + $0x2b0] sm:$0xff] %v2379_v36  ;;  %v1842_v40 = vadd.f32 %v1841_v39, %v850_v37  ;;  %v2194_v41 = vpop.f32.mrb[88].mxu0  ;;  %v1843_v42 = vpop.f32.mrb[89].mxu1 }
 0x1d2   : > { %2509 = vst.msk [vmem:[%s4270_s12 + $0x2b8] sm:$0xff] %vm2422_vm0, %v2380_v38  ;;  %v1844_v43 = vadd.f32 %v1843_v42, %v850_v37  ;;  %v2196_v44 = vpop.f32.mrb[89].mxu0  ;;  %v1845_v45 = vpop.f32.mrb[90].mxu1 }
 0x1d3   : > { %v2195_v46 = vadd.f32 %v2194_v41, %v1842_v40  ;;  %v1846_v47 = vadd.f32 %v1845_v45, %v855_v35  ;;  %v2198_v48 = vpop.f32.mrb[90].mxu0  ;;  %v1847_v49 = vpop.f32.mrb[91].mxu1 }
 0x1d4   : > { %v2197_v50 = vadd.f32 %v2196_v44, %v1844_v43  ;;  %v1848_v51 = vadd.f32 %v1847_v49, %v855_v35  ;;  %v2200_v52 = vpop.f32.mrb[91].mxu0  ;;  %v885_v37 = vpop.permute.xlu1 %884 }
 0x1d5   : > { %v2381_v53 = vmax.f32 %v2195_v46, 0.0  ;;  %v2199_v54 = vadd.f32 %v2198_v48, %v1846_v47  ;;  %v880_v39 = vpop.permute.xlu0 %879 }
 0x1d6   : > { %v2382_v55 = vmax.f32 %v2197_v50, 0.0  ;;  %v2201_v56 = vadd.f32 %v2200_v52, %v1848_v51 }
 0x1d7   : > { %2510 = vst [vmem:[%s4270_s12 + $0x2c0] sm:$0xff] %v2381_v53  ;;  %v2383_v58 = vmax.f32 %v2199_v54, 0.0 }
 0x1d8   : > { %2511 = vst.msk [vmem:[%s4270_s12 + $0x2c8] sm:$0xff] %vm2422_vm0, %v2382_v55  ;;  %v2384_v60 = vmax.f32 %v2201_v56, 0.0  ;;  %v1851_v61 = vpop.f32.mrb[92].mxu1 }
 0x1d9   : > { %2512 = vst [vmem:[%s4270_s12 + $0x2d0] sm:$0xff] %v2383_v58  ;;  %v1852_v62 = vadd.f32 %v1851_v61, %v860_v59  ;;  %v2204_v63 = vpop.f32.mrb[92].mxu0  ;;  %v1853_v0 = vpop.f32.mrb[93].mxu1 }
 0x1da   : > { %2513 = vst.msk [vmem:[%s4270_s12 + $0x2d8] sm:$0xff] %vm2422_vm0, %v2384_v60  ;;  %v1854_v1 = vadd.f32 %v1853_v0, %v860_v59  ;;  %v2206_v2 = vpop.f32.mrb[93].mxu0  ;;  %v1855_v3 = vpop.f32.mrb[94].mxu1 }
 0x1db   : > { %v2205_v4 = vadd.f32 %v2204_v63, %v1852_v62  ;;  %v1856_v5 = vadd.f32 %v1855_v3, %v865_v57  ;;  %v2208_v6 = vpop.f32.mrb[94].mxu0  ;;  %v1857_v7 = vpop.f32.mrb[95].mxu1 }
 0x1dc   : > { %v2207_v8 = vadd.f32 %v2206_v2, %v1854_v1  ;;  %v1858_v9 = vadd.f32 %v1857_v7, %v865_v57  ;;  %v2210_v10 = vpop.f32.mrb[95].mxu0  ;;  %v895_v59 = vpop.permute.xlu1 %894 }
 0x1dd   : > { %v2385_v11 = vmax.f32 %v2205_v4, 0.0  ;;  %v2209_v12 = vadd.f32 %v2208_v6, %v1856_v5  ;;  %v890_v61 = vpop.permute.xlu0 %889 }
 0x1de   : > { %v2386_v13 = vmax.f32 %v2207_v8, 0.0  ;;  %v2211_v14 = vadd.f32 %v2210_v10, %v1858_v9 }
 0x1df   : > { %2514 = vst [vmem:[%s4270_s12 + $0x2e0] sm:$0xff] %v2385_v11  ;;  %v2387_v16 = vmax.f32 %v2209_v12, 0.0 }
 0x1e0   : > { %2515 = vst.msk [vmem:[%s4270_s12 + $0x2e8] sm:$0xff] %vm2422_vm0, %v2386_v13  ;;  %v2388_v18 = vmax.f32 %v2211_v14, 0.0  ;;  %v1861_v19 = vpop.f32.mrb[96].mxu1 }
 0x1e1   : > { %2516 = vst [vmem:[%s4270_s12 + $0x2f0] sm:$0xff] %v2387_v16  ;;  %v1862_v20 = vadd.f32 %v1861_v19, %v870_v17  ;;  %v2214_v21 = vpop.f32.mrb[96].mxu0  ;;  %v1863_v22 = vpop.f32.mrb[97].mxu1 }
 0x1e2   : > { %2517 = vst.msk [vmem:[%s4270_s12 + $0x2f8] sm:$0xff] %vm2422_vm0, %v2388_v18  ;;  %v1864_v23 = vadd.f32 %v1863_v22, %v870_v17  ;;  %v2216_v24 = vpop.f32.mrb[97].mxu0  ;;  %v1865_v25 = vpop.f32.mrb[98].mxu1 }
 0x1e3   : > { %v2215_v26 = vadd.f32 %v2214_v21, %v1862_v20  ;;  %v1866_v27 = vadd.f32 %v1865_v25, %v875_v15  ;;  %v2218_v28 = vpop.f32.mrb[98].mxu0  ;;  %v1867_v29 = vpop.f32.mrb[99].mxu1 }
 0x1e4   : > { %v2217_v30 = vadd.f32 %v2216_v24, %v1864_v23  ;;  %v1868_v31 = vadd.f32 %v1867_v29, %v875_v15  ;;  %v2220_v32 = vpop.f32.mrb[99].mxu0  ;;  %v905_v17 = vpop.permute.xlu1 %904 }
 0x1e5   : > { %v2389_v33 = vmax.f32 %v2215_v26, 0.0  ;;  %v2219_v34 = vadd.f32 %v2218_v28, %v1866_v27  ;;  %v900_v19 = vpop.permute.xlu0 %899 }
 0x1e6   : > { %v2390_v35 = vmax.f32 %v2217_v30, 0.0  ;;  %v2221_v36 = vadd.f32 %v2220_v32, %v1868_v31 }
 0x1e7   : > { %2518 = vst [vmem:[%s4270_s12 + $0x300] sm:$0xff] %v2389_v33  ;;  %v2391_v38 = vmax.f32 %v2219_v34, 0.0 }
 0x1e8   : > { %2519 = vst.msk [vmem:[%s4270_s12 + $0x308] sm:$0xff] %vm2422_vm0, %v2390_v35  ;;  %v2392_v40 = vmax.f32 %v2221_v36, 0.0  ;;  %v1871_v41 = vpop.f32.mrb[100].mxu1 }
 0x1e9   : > { %2520 = vst [vmem:[%s4270_s12 + $0x310] sm:$0xff] %v2391_v38  ;;  %v1872_v42 = vadd.f32 %v1871_v41, %v880_v39  ;;  %v2224_v43 = vpop.f32.mrb[100].mxu0  ;;  %v1873_v44 = vpop.f32.mrb[101].mxu1 }
 0x1ea   : > { %2521 = vst.msk [vmem:[%s4270_s12 + $0x318] sm:$0xff] %vm2422_vm0, %v2392_v40  ;;  %v1874_v45 = vadd.f32 %v1873_v44, %v880_v39  ;;  %v2226_v46 = vpop.f32.mrb[101].mxu0  ;;  %v1875_v47 = vpop.f32.mrb[102].mxu1 }
 0x1eb   : > { %v2225_v48 = vadd.f32 %v2224_v43, %v1872_v42  ;;  %v1876_v49 = vadd.f32 %v1875_v47, %v885_v37  ;;  %v2228_v50 = vpop.f32.mrb[102].mxu0  ;;  %v1877_v51 = vpop.f32.mrb[103].mxu1 }
 0x1ec   : > { %v2227_v52 = vadd.f32 %v2226_v46, %v1874_v45  ;;  %v1878_v53 = vadd.f32 %v1877_v51, %v885_v37  ;;  %v2230_v54 = vpop.f32.mrb[103].mxu0  ;;  %v915_v39 = vpop.permute.xlu1 %914 }
 0x1ed   : > { %v2393_v55 = vmax.f32 %v2225_v48, 0.0  ;;  %v2229_v56 = vadd.f32 %v2228_v50, %v1876_v49  ;;  %v910_v41 = vpop.permute.xlu0 %909 }
 0x1ee   : > { %v2394_v57 = vmax.f32 %v2227_v52, 0.0  ;;  %v2231_v58 = vadd.f32 %v2230_v54, %v1878_v53 }
 0x1ef   : > { %2522 = vst [vmem:[%s4270_s12 + $0x320] sm:$0xff] %v2393_v55  ;;  %v2395_v60 = vmax.f32 %v2229_v56, 0.0 }
 0x1f0   : > { %2523 = vst.msk [vmem:[%s4270_s12 + $0x328] sm:$0xff] %vm2422_vm0, %v2394_v57  ;;  %v2396_v62 = vmax.f32 %v2231_v58, 0.0  ;;  %v1881_v63 = vpop.f32.mrb[104].mxu1 }
 0x1f1   : > { %2524 = vst [vmem:[%s4270_s12 + $0x330] sm:$0xff] %v2395_v60  ;;  %v1882_v0 = vadd.f32 %v1881_v63, %v890_v61  ;;  %v2234_v1 = vpop.f32.mrb[104].mxu0  ;;  %v1883_v2 = vpop.f32.mrb[105].mxu1 }
 0x1f2   : > { %2525 = vst.msk [vmem:[%s4270_s12 + $0x338] sm:$0xff] %vm2422_vm0, %v2396_v62  ;;  %v1884_v3 = vadd.f32 %v1883_v2, %v890_v61  ;;  %v2236_v4 = vpop.f32.mrb[105].mxu0  ;;  %v1885_v5 = vpop.f32.mrb[106].mxu1 }
 0x1f3   : > { %v2235_v6 = vadd.f32 %v2234_v1, %v1882_v0  ;;  %v1886_v7 = vadd.f32 %v1885_v5, %v895_v59  ;;  %v2238_v8 = vpop.f32.mrb[106].mxu0  ;;  %v1887_v9 = vpop.f32.mrb[107].mxu1 }
 0x1f4   : > { %v2237_v10 = vadd.f32 %v2236_v4, %v1884_v3  ;;  %v1888_v11 = vadd.f32 %v1887_v9, %v895_v59  ;;  %v2240_v12 = vpop.f32.mrb[107].mxu0  ;;  %v925_v61 = vpop.permute.xlu1 %924 }
 0x1f5   : > { %v2397_v13 = vmax.f32 %v2235_v6, 0.0  ;;  %v2239_v14 = vadd.f32 %v2238_v8, %v1886_v7  ;;  %v920_v63 = vpop.permute.xlu0 %919 }
 0x1f6   : > { %v2398_v15 = vmax.f32 %v2237_v10, 0.0  ;;  %v2241_v16 = vadd.f32 %v2240_v12, %v1888_v11 }
 0x1f7   : > { %2526 = vst [vmem:[%s4270_s12 + $0x340] sm:$0xff] %v2397_v13  ;;  %v2399_v18 = vmax.f32 %v2239_v14, 0.0 }
 0x1f8   : > { %2527 = vst.msk [vmem:[%s4270_s12 + $0x348] sm:$0xff] %vm2422_vm0, %v2398_v15  ;;  %v2400_v20 = vmax.f32 %v2241_v16, 0.0  ;;  %v1891_v21 = vpop.f32.mrb[108].mxu1 }
 0x1f9   : > { %2528 = vst [vmem:[%s4270_s12 + $0x350] sm:$0xff] %v2399_v18  ;;  %v1892_v22 = vadd.f32 %v1891_v21, %v900_v19  ;;  %v2244_v23 = vpop.f32.mrb[108].mxu0  ;;  %v1893_v24 = vpop.f32.mrb[109].mxu1 }
 0x1fa   : > { %2529 = vst.msk [vmem:[%s4270_s12 + $0x358] sm:$0xff] %vm2422_vm0, %v2400_v20  ;;  %v1894_v25 = vadd.f32 %v1893_v24, %v900_v19  ;;  %v2246_v26 = vpop.f32.mrb[109].mxu0  ;;  %v1895_v27 = vpop.f32.mrb[110].mxu1 }
 0x1fb   : > { %v2245_v28 = vadd.f32 %v2244_v23, %v1892_v22  ;;  %v1896_v29 = vadd.f32 %v1895_v27, %v905_v17  ;;  %v2248_v30 = vpop.f32.mrb[110].mxu0  ;;  %v1897_v31 = vpop.f32.mrb[111].mxu1 }
 0x1fc   : > { %v2247_v32 = vadd.f32 %v2246_v26, %v1894_v25  ;;  %v1898_v33 = vadd.f32 %v1897_v31, %v905_v17  ;;  %v2250_v34 = vpop.f32.mrb[111].mxu0  ;;  %v935_v19 = vpop.permute.xlu1 %934 }
 0x1fd   : > { %v2401_v35 = vmax.f32 %v2245_v28, 0.0  ;;  %v2249_v36 = vadd.f32 %v2248_v30, %v1896_v29  ;;  %v930_v21 = vpop.permute.xlu0 %929 }
 0x1fe   : > { %v2402_v37 = vmax.f32 %v2247_v32, 0.0  ;;  %v2251_v38 = vadd.f32 %v2250_v34, %v1898_v33 }
 0x1ff   : > { %2530 = vst [vmem:[%s4270_s12 + $0x360] sm:$0xff] %v2401_v35  ;;  %v2403_v40 = vmax.f32 %v2249_v36, 0.0 }
 0x200   : > { %2531 = vst.msk [vmem:[%s4270_s12 + $0x368] sm:$0xff] %vm2422_vm0, %v2402_v37  ;;  %v2404_v42 = vmax.f32 %v2251_v38, 0.0  ;;  %v1901_v43 = vpop.f32.mrb[112].mxu1 }
 0x201   : > { %2532 = vst [vmem:[%s4270_s12 + $0x370] sm:$0xff] %v2403_v40  ;;  %v1902_v44 = vadd.f32 %v1901_v43, %v910_v41  ;;  %v2254_v45 = vpop.f32.mrb[112].mxu0  ;;  %v1903_v46 = vpop.f32.mrb[113].mxu1 }
 0x202   : > { %2533 = vst.msk [vmem:[%s4270_s12 + $0x378] sm:$0xff] %vm2422_vm0, %v2404_v42  ;;  %v1904_v47 = vadd.f32 %v1903_v46, %v910_v41  ;;  %v2256_v48 = vpop.f32.mrb[113].mxu0  ;;  %v1905_v49 = vpop.f32.mrb[114].mxu1 }
 0x203   : > { %v2255_v50 = vadd.f32 %v2254_v45, %v1902_v44  ;;  %v1906_v51 = vadd.f32 %v1905_v49, %v915_v39  ;;  %v2258_v52 = vpop.f32.mrb[114].mxu0  ;;  %v1907_v53 = vpop.f32.mrb[115].mxu1 }
 0x204   : > { %v2257_v54 = vadd.f32 %v2256_v48, %v1904_v47  ;;  %v1908_v55 = vadd.f32 %v1907_v53, %v915_v39  ;;  %v2260_v56 = vpop.f32.mrb[115].mxu0  ;;  %v945_v41 = vpop.permute.xlu1 %944 }
 0x205   : > { %v2405_v57 = vmax.f32 %v2255_v50, 0.0  ;;  %v2259_v58 = vadd.f32 %v2258_v52, %v1906_v51  ;;  %v940_v43 = vpop.permute.xlu0 %939 }
 0x206   : > { %v2406_v59 = vmax.f32 %v2257_v54, 0.0  ;;  %v2261_v60 = vadd.f32 %v2260_v56, %v1908_v55 }
 0x207   : > { %2534 = vst [vmem:[%s4270_s12 + $0x380] sm:$0xff] %v2405_v57  ;;  %v2407_v62 = vmax.f32 %v2259_v58, 0.0 }
 0x208   : > { %2535 = vst.msk [vmem:[%s4270_s12 + $0x388] sm:$0xff] %vm2422_vm0, %v2406_v59  ;;  %v2408_v0 = vmax.f32 %v2261_v60, 0.0  ;;  %v1911_v1 = vpop.f32.mrb[116].mxu1 }
 0x209   : > { %2536 = vst [vmem:[%s4270_s12 + $0x390] sm:$0xff] %v2407_v62  ;;  %v1912_v2 = vadd.f32 %v1911_v1, %v920_v63  ;;  %v2264_v3 = vpop.f32.mrb[116].mxu0  ;;  %v1913_v4 = vpop.f32.mrb[117].mxu1 }
 0x20a   : > { %2537 = vst.msk [vmem:[%s4270_s12 + $0x398] sm:$0xff] %vm2422_vm0, %v2408_v0  ;;  %v1914_v5 = vadd.f32 %v1913_v4, %v920_v63  ;;  %v2266_v6 = vpop.f32.mrb[117].mxu0  ;;  %v1915_v7 = vpop.f32.mrb[118].mxu1 }
 0x20b   : > { %v2265_v8 = vadd.f32 %v2264_v3, %v1912_v2  ;;  %v1916_v9 = vadd.f32 %v1915_v7, %v925_v61  ;;  %v2268_v10 = vpop.f32.mrb[118].mxu0  ;;  %v1917_v11 = vpop.f32.mrb[119].mxu1 }
 0x20c   : > { %v2267_v12 = vadd.f32 %v2266_v6, %v1914_v5  ;;  %v1918_v13 = vadd.f32 %v1917_v11, %v925_v61  ;;  %v2270_v14 = vpop.f32.mrb[119].mxu0 }
 0x20d   : > { %v2409_v15 = vmax.f32 %v2265_v8, 0.0  ;;  %v2269_v16 = vadd.f32 %v2268_v10, %v1916_v9 }
 0x20e   : > { %v2410_v17 = vmax.f32 %v2267_v12, 0.0  ;;  %v2271_v18 = vadd.f32 %v2270_v14, %v1918_v13 }
 0x20f   : > { %2538 = vst [vmem:[%s4270_s12 + $0x3a0] sm:$0xff] %v2409_v15  ;;  %v2411_v20 = vmax.f32 %v2269_v16, 0.0 }
 0x210   : > { %2539 = vst.msk [vmem:[%s4270_s12 + $0x3a8] sm:$0xff] %vm2422_vm0, %v2410_v17  ;;  %v2412_v22 = vmax.f32 %v2271_v18, 0.0  ;;  %v1921_v23 = vpop.f32.mrb[120].mxu1 }
 0x211   : > { %2540 = vst [vmem:[%s4270_s12 + $0x3b0] sm:$0xff] %v2411_v20  ;;  %v1922_v24 = vadd.f32 %v1921_v23, %v930_v21  ;;  %v2274_v25 = vpop.f32.mrb[120].mxu0  ;;  %v1923_v26 = vpop.f32.mrb[121].mxu1 }
 0x212   : > { %2541 = vst.msk [vmem:[%s4270_s12 + $0x3b8] sm:$0xff] %vm2422_vm0, %v2412_v22  ;;  %v1924_v27 = vadd.f32 %v1923_v26, %v930_v21  ;;  %v2276_v28 = vpop.f32.mrb[121].mxu0  ;;  %v1925_v29 = vpop.f32.mrb[122].mxu1 }
 0x213   : > { %v2275_v30 = vadd.f32 %v2274_v25, %v1922_v24  ;;  %v1926_v31 = vadd.f32 %v1925_v29, %v935_v19  ;;  %v2278_v32 = vpop.f32.mrb[122].mxu0  ;;  %v1927_v33 = vpop.f32.mrb[123].mxu1 }
 0x214   : > { %v2277_v34 = vadd.f32 %v2276_v28, %v1924_v27  ;;  %v1928_v35 = vadd.f32 %v1927_v33, %v935_v19  ;;  %v2280_v36 = vpop.f32.mrb[123].mxu0 }
 0x215   : > { %v2413_v37 = vmax.f32 %v2275_v30, 0.0  ;;  %v2279_v38 = vadd.f32 %v2278_v32, %v1926_v31 }
 0x216   : > { %v2414_v39 = vmax.f32 %v2277_v34, 0.0  ;;  %v2281_v40 = vadd.f32 %v2280_v36, %v1928_v35 }
 0x217   : > { %2542 = vst [vmem:[%s4270_s12 + $0x3c0] sm:$0xff] %v2413_v37  ;;  %v2415_v42 = vmax.f32 %v2279_v38, 0.0 }
 0x218   : > { %2543 = vst.msk [vmem:[%s4270_s12 + $0x3c8] sm:$0xff] %vm2422_vm0, %v2414_v39  ;;  %v2416_v44 = vmax.f32 %v2281_v40, 0.0  ;;  %v1931_v45 = vpop.f32.mrb[124].mxu1 }
 0x219   : > { %2544 = vst [vmem:[%s4270_s12 + $0x3d0] sm:$0xff] %v2415_v42  ;;  %v1932_v46 = vadd.f32 %v1931_v45, %v940_v43  ;;  %v2284_v47 = vpop.f32.mrb[124].mxu0  ;;  %v1933_v48 = vpop.f32.mrb[125].mxu1 }
 0x21a   : > { %2545 = vst.msk [vmem:[%s4270_s12 + $0x3d8] sm:$0xff] %vm2422_vm0, %v2416_v44  ;;  %v1934_v49 = vadd.f32 %v1933_v48, %v940_v43  ;;  %v2286_v50 = vpop.f32.mrb[125].mxu0  ;;  %v1935_v51 = vpop.f32.mrb[126].mxu1 }
 0x21b   : > { %v2285_v52 = vadd.f32 %v2284_v47, %v1932_v46  ;;  %v1936_v53 = vadd.f32 %v1935_v51, %v945_v41  ;;  %v2288_v54 = vpop.f32.mrb[126].mxu0  ;;  %v1937_v55 = vpop.f32.mrb[127].mxu1 }
 0x21c   : > { %v2287_v56 = vadd.f32 %v2286_v50, %v1934_v49  ;;  %v1938_v57 = vadd.f32 %v1937_v55, %v945_v41  ;;  %v2290_v58 = vpop.f32.mrb[127].mxu0  ;;  %2556 = sbr.rel (!%p3682_p4) target bundleno = 619 (0x26b), region = 36 }
 0x21d   : > { %v2417_v59 = vmax.f32 %v2285_v52, 0.0  ;;  %v2289_v60 = vadd.f32 %v2288_v54, %v1936_v53 }
 0x21e   : > { %v2418_v61 = vmax.f32 %v2287_v56, 0.0  ;;  %v2291_v62 = vadd.f32 %v2290_v58, %v1938_v57 }
 0x21f   : > { %2546 = vst [vmem:[%s4270_s12 + $0x3e0] sm:$0xff] %v2417_v59  ;;  %v2419_v63 = vmax.f32 %v2289_v60, 0.0 }
 0x220   : > { %2547 = vst.msk [vmem:[%s4270_s12 + $0x3e8] sm:$0xff] %vm2422_vm0, %v2418_v61  ;;  %v2420_v0 = vmax.f32 %v2291_v62, 0.0 }
 0x221   : > { %2548 = vst [vmem:[%s4270_s12 + $0x3f0] sm:$0xff] %v2419_v63 }
 0x222   : > { %2549 = vst.msk [vmem:[%s4270_s12 + $0x3f8] sm:$0xff] %vm2422_vm0, %v2420_v0 }
 0x223   : > { %s4702_s5 = smov (!%p2559_p8, %s2558_s5), 64 }
 0x224   : > { %s3004_s10 = sshll.u32 %s4702_s5, 8 }
 0x225   : > { %p2991_p9 = scmp.eq.s32.totalorder %s3004_s10, 0 }
 0x226   : > { %s4491_s11 = sshrl.u32 (!%p2991_p9), %s4702_s5, 5 }
 0x227   : > { %2569 = sbr.rel (%p2991_p9) target bundleno = 619 (0x26b), region = 40  ;;  %p2992_p10 = scmp.le.s32.totalorder (!%p2991_p9), %s4491_s11, 0 }
 0x22e   : > { %2796 = sbr.rel (%p2992_p10) target bundleno = 598 (0x256), region = 91  ;;  %s4693_s15 = smov (!%p2992_p10), %s4485_s9 }
 0x22f   : > { %s4694_s20 = smov (!%p2992_p10), %s4270_s12  ;;  %s4500_s27 = smov (!%p2992_p10), 0  }
 0x230   : > { %s4502_s14 = smov (!%p2992_p10), 0  }
 0x235 LB: >> { %v2582_v1 = vld [vmem:[%s3610_s20] sm:$0xff]  ;;  %v2584_v2 = vld [vmem:[%s3610_s20 + $0x10] sm:$0xff]  ;;  %s2710_s4 = sadd.s32 1, %s3614_s27  ;;  %v2646_v33 = vld [vmem:[%s3610_s20 + $0x8] sm:$0xff]  ;;  %s2576_s14 = sadd.s32 1, %s3618_s14   ;;  %s3618_s14 = sphi %s4502_s14, %s2576_s14   ;;  %s3614_s27 = sphi %s4500_s27, %s4697_s27   ;;  %s3610_s20 = sphi %s4694_s20, %s4696_s20   ;;  %s3606_s15 = sphi %s4693_s15, %s4695_s15  }
 0x236   : >> { %v2586_v3 = vld [vmem:[%s3610_s20 + $0x20] sm:$0xff]  ;;  %2583 = vst [vmem:[%s3606_s15] sm:$0xff] %v2582_v1  ;;  %2585 = vst [vmem:[%s3606_s15 + $0x10] sm:$0xff] %v2584_v2  ;;  %v2588_v4 = vld [vmem:[%s3610_s20 + $0x30] sm:$0xff]  ;;  %p2711_p11 = scmp.ge.s32.totalorder %s2710_s4, %s4491_s11  ;;  %p2575_p12 = scmp.ge.s32.totalorder %s2576_s14, %s4491_s11 }
 0x237   : >> { %2587 = vst [vmem:[%s3606_s15 + $0x20] sm:$0xff] %v2586_v3  ;;  %v2590_v5 = vld [vmem:[%s3610_s20 + $0x40] sm:$0xff]  ;;  %v2592_v6 = vld [vmem:[%s3610_s20 + $0x50] sm:$0xff]  ;;  %2589 = vst [vmem:[%s3606_s15 + $0x30] sm:$0xff] %v2588_v4 }
 0x238   : >> { %2591 = vst [vmem:[%s3606_s15 + $0x40] sm:$0xff] %v2590_v5  ;;  %2593 = vst [vmem:[%s3606_s15 + $0x50] sm:$0xff] %v2592_v6  ;;  %v2594_v7 = vld [vmem:[%s3610_s20 + $0x60] sm:$0xff]  ;;  %v2596_v8 = vld [vmem:[%s3610_s20 + $0x70] sm:$0xff]  ;;  %s4704_s4 = smov (%p2711_p11, %s2710_s4), 0 }
 0x239   : >> { %v2598_v9 = vld [vmem:[%s3610_s20 + $0x80] sm:$0xff]  ;;  %2595 = vst [vmem:[%s3606_s15 + $0x60] sm:$0xff] %v2594_v7  ;;  %2597 = vst [vmem:[%s3606_s15 + $0x70] sm:$0xff] %v2596_v8  ;;  %v2600_v10 = vld [vmem:[%s3610_s20 + $0x90] sm:$0xff]  ;;  %s2993_s17 = sshll.u32 %s4704_s4, 9  ;;  %s4697_s27 = smov %s4704_s4 }
 0x23a   : >> { %2599 = vst [vmem:[%s3606_s15 + $0x80] sm:$0xff] %v2598_v9  ;;  %v2602_v11 = vld [vmem:[%s3610_s20 + $0xa0] sm:$0xff]  ;;  %v2604_v12 = vld [vmem:[%s3610_s20 + $0xb0] sm:$0xff]  ;;  %2601 = vst [vmem:[%s3606_s15 + $0x90] sm:$0xff] %v2600_v10  ;;  %s4558_s18 = scalar_lea.vmem %s4270_s12, %s2993_s17 [#allocation2]   ;;  %s4561_s21 = scalar_lea.vmem %s4485_s9, %s2993_s17  }
 0x23b   : >> { %2603 = vst [vmem:[%s3606_s15 + $0xa0] sm:$0xff] %v2602_v11  ;;  %2605 = vst [vmem:[%s3606_s15 + $0xb0] sm:$0xff] %v2604_v12  ;;  %v2606_v13 = vld [vmem:[%s3610_s20 + $0xc0] sm:$0xff]  ;;  %v2608_v14 = vld [vmem:[%s3610_s20 + $0xd0] sm:$0xff] }
 0x23c   : >> { %v2610_v15 = vld [vmem:[%s3610_s20 + $0xe0] sm:$0xff]  ;;  %2607 = vst [vmem:[%s3606_s15 + $0xc0] sm:$0xff] %v2606_v13  ;;  %2609 = vst [vmem:[%s3606_s15 + $0xd0] sm:$0xff] %v2608_v14  ;;  %v2612_v16 = vld [vmem:[%s3610_s20 + $0xf0] sm:$0xff] }
 0x23d   : >> { %2611 = vst [vmem:[%s3606_s15 + $0xe0] sm:$0xff] %v2610_v15  ;;  %v2614_v17 = vld [vmem:[%s3610_s20 + $0x100] sm:$0xff]  ;;  %v2616_v18 = vld [vmem:[%s3610_s20 + $0x110] sm:$0xff]  ;;  %2613 = vst [vmem:[%s3606_s15 + $0xf0] sm:$0xff] %v2612_v16 }
 0x23e   : >> { %2615 = vst [vmem:[%s3606_s15 + $0x100] sm:$0xff] %v2614_v17  ;;  %2617 = vst [vmem:[%s3606_s15 + $0x110] sm:$0xff] %v2616_v18  ;;  %v2618_v19 = vld [vmem:[%s3610_s20 + $0x120] sm:$0xff]  ;;  %v2620_v20 = vld [vmem:[%s3610_s20 + $0x130] sm:$0xff] }
 0x23f   : >> { %v2622_v21 = vld [vmem:[%s3610_s20 + $0x140] sm:$0xff]  ;;  %2619 = vst [vmem:[%s3606_s15 + $0x120] sm:$0xff] %v2618_v19  ;;  %2621 = vst [vmem:[%s3606_s15 + $0x130] sm:$0xff] %v2620_v20  ;;  %v2624_v22 = vld [vmem:[%s3610_s20 + $0x150] sm:$0xff] }
 0x240   : >> { %2623 = vst [vmem:[%s3606_s15 + $0x140] sm:$0xff] %v2622_v21  ;;  %v2626_v23 = vld [vmem:[%s3610_s20 + $0x160] sm:$0xff]  ;;  %v2628_v24 = vld [vmem:[%s3610_s20 + $0x170] sm:$0xff]  ;;  %2625 = vst [vmem:[%s3606_s15 + $0x150] sm:$0xff] %v2624_v22 }
 0x241   : >> { %2627 = vst [vmem:[%s3606_s15 + $0x160] sm:$0xff] %v2626_v23  ;;  %2629 = vst [vmem:[%s3606_s15 + $0x170] sm:$0xff] %v2628_v24  ;;  %v2630_v25 = vld [vmem:[%s3610_s20 + $0x180] sm:$0xff]  ;;  %v2632_v26 = vld [vmem:[%s3610_s20 + $0x190] sm:$0xff] }
 0x242   : >> { %v2634_v27 = vld [vmem:[%s3610_s20 + $0x1a0] sm:$0xff]  ;;  %2631 = vst [vmem:[%s3606_s15 + $0x180] sm:$0xff] %v2630_v25  ;;  %2633 = vst [vmem:[%s3606_s15 + $0x190] sm:$0xff] %v2632_v26  ;;  %v2636_v28 = vld [vmem:[%s3610_s20 + $0x1b0] sm:$0xff] }
 0x243   : >> { %2635 = vst [vmem:[%s3606_s15 + $0x1a0] sm:$0xff] %v2634_v27  ;;  %v2638_v29 = vld [vmem:[%s3610_s20 + $0x1c0] sm:$0xff]  ;;  %v2640_v30 = vld [vmem:[%s3610_s20 + $0x1d0] sm:$0xff]  ;;  %2637 = vst [vmem:[%s3606_s15 + $0x1b0] sm:$0xff] %v2636_v28 }
 0x244   : >> { %2639 = vst [vmem:[%s3606_s15 + $0x1c0] sm:$0xff] %v2638_v29  ;;  %2641 = vst [vmem:[%s3606_s15 + $0x1d0] sm:$0xff] %v2640_v30  ;;  %v2642_v31 = vld [vmem:[%s3610_s20 + $0x1e0] sm:$0xff]  ;;  %v2644_v32 = vld [vmem:[%s3610_s20 + $0x1f0] sm:$0xff] }
 0x245   : >> { %2643 = vst [vmem:[%s3606_s15 + $0x1e0] sm:$0xff] %v2642_v31  ;;  %2645 = vst [vmem:[%s3606_s15 + $0x1f0] sm:$0xff] %v2644_v32  ;;  %v2648_v34 = vld [vmem:[%s3610_s20 + $0x18] sm:$0xff]  ;;  %v2650_v35 = vld [vmem:[%s3610_s20 + $0x28] sm:$0xff] }
 0x246   : >> { %2647 = vst [vmem:[%s3606_s15 + $0x8] sm:$0xff] %v2646_v33  ;;  %v2652_v36 = vld [vmem:[%s3610_s20 + $0x38] sm:$0xff]  ;;  %2649 = vst [vmem:[%s3606_s15 + $0x18] sm:$0xff] %v2648_v34  ;;  %v2654_v37 = vld [vmem:[%s3610_s20 + $0x48] sm:$0xff] }
 0x247   : >> { %2651 = vst [vmem:[%s3606_s15 + $0x28] sm:$0xff] %v2650_v35  ;;  %2653 = vst [vmem:[%s3606_s15 + $0x38] sm:$0xff] %v2652_v36  ;;  %v2656_v38 = vld [vmem:[%s3610_s20 + $0x58] sm:$0xff]  ;;  %v2658_v39 = vld [vmem:[%s3610_s20 + $0x68] sm:$0xff] }
 0x248   : >> { %2655 = vst [vmem:[%s3606_s15 + $0x48] sm:$0xff] %v2654_v37  ;;  %2657 = vst [vmem:[%s3606_s15 + $0x58] sm:$0xff] %v2656_v38  ;;  %v2660_v40 = vld [vmem:[%s3610_s20 + $0x78] sm:$0xff]  ;;  %v2662_v41 = vld [vmem:[%s3610_s20 + $0x88] sm:$0xff] }
 0x249   : >> { %2659 = vst [vmem:[%s3606_s15 + $0x68] sm:$0xff] %v2658_v39  ;;  %v2664_v42 = vld [vmem:[%s3610_s20 + $0x98] sm:$0xff]  ;;  %2661 = vst [vmem:[%s3606_s15 + $0x78] sm:$0xff] %v2660_v40  ;;  %v2666_v43 = vld [vmem:[%s3610_s20 + $0xa8] sm:$0xff] }
 0x24a   : >> { %2663 = vst [vmem:[%s3606_s15 + $0x88] sm:$0xff] %v2662_v41  ;;  %2665 = vst [vmem:[%s3606_s15 + $0x98] sm:$0xff] %v2664_v42  ;;  %v2668_v44 = vld [vmem:[%s3610_s20 + $0xb8] sm:$0xff]  ;;  %v2670_v45 = vld [vmem:[%s3610_s20 + $0xc8] sm:$0xff] }
 0x24b   : >> { %2667 = vst [vmem:[%s3606_s15 + $0xa8] sm:$0xff] %v2666_v43  ;;  %2669 = vst [vmem:[%s3606_s15 + $0xb8] sm:$0xff] %v2668_v44  ;;  %v2672_v46 = vld [vmem:[%s3610_s20 + $0xd8] sm:$0xff]  ;;  %v2674_v47 = vld [vmem:[%s3610_s20 + $0xe8] sm:$0xff] }
 0x24c   : >> { %2671 = vst [vmem:[%s3606_s15 + $0xc8] sm:$0xff] %v2670_v45  ;;  %v2676_v48 = vld [vmem:[%s3610_s20 + $0xf8] sm:$0xff]  ;;  %2673 = vst [vmem:[%s3606_s15 + $0xd8] sm:$0xff] %v2672_v46  ;;  %v2678_v49 = vld [vmem:[%s3610_s20 + $0x108] sm:$0xff] }
 0x24d   : >> { %2675 = vst [vmem:[%s3606_s15 + $0xe8] sm:$0xff] %v2674_v47  ;;  %2677 = vst [vmem:[%s3606_s15 + $0xf8] sm:$0xff] %v2676_v48  ;;  %v2680_v50 = vld [vmem:[%s3610_s20 + $0x118] sm:$0xff]  ;;  %v2682_v51 = vld [vmem:[%s3610_s20 + $0x128] sm:$0xff] }
 0x24e   : >> { %2679 = vst [vmem:[%s3606_s15 + $0x108] sm:$0xff] %v2678_v49  ;;  %2681 = vst [vmem:[%s3606_s15 + $0x118] sm:$0xff] %v2680_v50  ;;  %v2684_v52 = vld [vmem:[%s3610_s20 + $0x138] sm:$0xff]  ;;  %v2686_v53 = vld [vmem:[%s3610_s20 + $0x148] sm:$0xff] }
 0x24f   : >> { %2683 = vst [vmem:[%s3606_s15 + $0x128] sm:$0xff] %v2682_v51  ;;  %v2688_v54 = vld [vmem:[%s3610_s20 + $0x158] sm:$0xff]  ;;  %2685 = vst [vmem:[%s3606_s15 + $0x138] sm:$0xff] %v2684_v52  ;;  %v2690_v55 = vld [vmem:[%s3610_s20 + $0x168] sm:$0xff]  ;;  %2578 = sbr.rel (!%p2575_p12) target bundleno = 565 (0x235), region = 97 }
 0x250   : >> { %2687 = vst [vmem:[%s3606_s15 + $0x148] sm:$0xff] %v2686_v53  ;;  %2689 = vst [vmem:[%s3606_s15 + $0x158] sm:$0xff] %v2688_v54  ;;  %v2692_v56 = vld [vmem:[%s3610_s20 + $0x178] sm:$0xff]  ;;  %v2694_v57 = vld [vmem:[%s3610_s20 + $0x188] sm:$0xff] }
 0x251   : >> { %2691 = vst [vmem:[%s3606_s15 + $0x168] sm:$0xff] %v2690_v55  ;;  %2693 = vst [vmem:[%s3606_s15 + $0x178] sm:$0xff] %v2692_v56  ;;  %v2696_v58 = vld [vmem:[%s3610_s20 + $0x198] sm:$0xff]  ;;  %v2698_v59 = vld [vmem:[%s3610_s20 + $0x1a8] sm:$0xff] }
 0x252   : >> { %2695 = vst [vmem:[%s3606_s15 + $0x188] sm:$0xff] %v2694_v57  ;;  %v2700_v60 = vld [vmem:[%s3610_s20 + $0x1b8] sm:$0xff]  ;;  %2697 = vst [vmem:[%s3606_s15 + $0x198] sm:$0xff] %v2696_v58  ;;  %v2702_v61 = vld [vmem:[%s3610_s20 + $0x1c8] sm:$0xff] }
 0x253   : >> { %2699 = vst [vmem:[%s3606_s15 + $0x1a8] sm:$0xff] %v2698_v59  ;;  %2701 = vst [vmem:[%s3606_s15 + $0x1b8] sm:$0xff] %v2700_v60  ;;  %v2704_v62 = vld [vmem:[%s3610_s20 + $0x1d8] sm:$0xff]  ;;  %v2706_v63 = vld [vmem:[%s3610_s20 + $0x1e8] sm:$0xff] }
 0x254   : >> { %2703 = vst [vmem:[%s3606_s15 + $0x1c8] sm:$0xff] %v2702_v61  ;;  %2705 = vst [vmem:[%s3606_s15 + $0x1d8] sm:$0xff] %v2704_v62  ;;  %v2708_v0 = vld [vmem:[%s3610_s20 + $0x1f8] sm:$0xff]  ;;  %s4696_s20 = smov %s4558_s18 }
 0x255   : >> { %2707 = vst [vmem:[%s3606_s15 + $0x1e8] sm:$0xff] %v2706_v63  ;;  %2709 = vst [vmem:[%s3606_s15 + $0x1f8] sm:$0xff] %v2708_v0  ;;  %s4695_s15 = smov %s4561_s21 }
 0x256 PF: > { %s4666_s22 = sand.u32 31, %s4702_s5   ;;  %s3007_s23 = sshll.u32 %s4491_s11, 9 }
 0x257   : > { %s4670_s24 = scalar_lea.vmem %s4270_s12, %s3007_s23 [#allocation2]   ;;  %s2723_s25 = scalar_lea.vmem %s4485_s9, %s3007_s23  }
 0x258   : > { %p2998_p13 = scmp.le.s32.totalorder %s4666_s22, 0 }
 0x259   : > { %s3620_s26 = smov (!%p2998_p13), %s2723_s25   ;;  %s3624_s28 = smov (!%p2998_p13), %s4670_s24  }
 0x25a   : > { %2810 = sbr.rel (%p2998_p13) target bundleno = 619 (0x26b), region = 102  ;;  %s3628_s7 = smov (!%p2998_p13), 0  }
 0x25b   : > { %s3632_s29 = smov (!%p2998_p13), 0  }
 0x261 LB: >> { %v2733_v1 = vld [vmem:[%s3626_s28] sm:$0xff]  ;;  %v2735_v2 = vld [vmem:[%s3626_s28 + $0x8] sm:$0xff]  ;;  %s2737_s12 = sadd.s32 1, %s3630_s7  ;;  %s2727_s29 = sadd.s32 1, %s3634_s29   ;;  %s3634_s29 = sphi %s3632_s29, %s2727_s29   ;;  %s3630_s7 = sphi %s3628_s7, %s3629_s7   ;;  %s3626_s28 = sphi %s3624_s28, %s2742_s28   ;;  %s3622_s26 = sphi %s3620_s26, %s2743_s26  }
 0x262   : >> { %2734 = vst [vmem:[%s3622_s26] sm:$0xff] %v2733_v1  ;;  %2736 = vst [vmem:[%s3622_s26 + $0x8] sm:$0xff] %v2735_v2  ;;  %p2738_p0 = scmp.ge.s32.totalorder %s2737_s12, %s4666_s22  ;;  %p2726_p1 = scmp.ge.s32.totalorder %s2727_s29, %s4666_s22 }
 0x264   : >> { %s4706_s12 = smov (%p2738_p0, %s2737_s12), 0  ;;  %2729 = sbr.rel (!%p2726_p1) target bundleno = 609 (0x261), region = 108 }
 0x265   : >> { %s2999_s5 = sshll.u32 %s4706_s12, 4  ;;  %s3629_s7 = smov %s4706_s12  }
 0x266   : >> { %s2742_s28 = scalar_lea.vmem %s4670_s24, %s2999_s5 [#allocation2]   ;;  %s2743_s26 = scalar_lea.vmem %s2723_s25, %s2999_s5  }
 0x26b PF: > { %p10_p2 = scmp.ge.s32.totalorder %s3672_s16, 4   ;;  %s4698_s12 = smov %s3598_s13 }
 0x26c   : > { %s4699_s13 = smov %s3680_s19  ;;  %s4700_s14 = smov %s3672_s16 }
 0x26d   :  { %12 = sbr.rel (!%p10_p2) target bundleno = 2 (0x2), region = 119 }

</bundles_post_ra>
